<compile_context>
chip_gen: v5e
topology: v5e:2x2
jax: 0.10.0
libtpu: 0.0.40
codegen_flags: <defaults>
</compile_context>

<pallas_src>
import functools
import math

import jax
import jax.numpy as jnp
from jax.experimental import pallas as pl
from jax.experimental.pallas import tpu as pltpu

SELU_ALPHA = 1.6732632423543772
SELU_SCALE = 1.0507009873554805
LN_EPS = 1e-5


def _cross_attn_kernel(q_ref, x_ref,
                       ln_g, ln_b,
                       wq_t, bq, wk_t, bk, wv_t, bv, wo_t, bo,
                       w1_t, b1, w2_t, b2,
                       out_ref,
                       *, n_heads, matmul_dtype, approx_recip):
    # q_ref: (Bt, Lq, qdim)   x_ref: (Bt, Lkv, dim)
    Bt, Lq, qdim = q_ref.shape
    _, Lkv, dim = x_ref.shape
    head_dim = qdim // n_heads

    # Flatten the batch tile into the matmul M dimension.  Leading-dim
    # merges/splits only (lane dim untouched) -> layout-cheap.
    Qf = q_ref[...].astype(jnp.float32).reshape(Bt * Lq, qdim)
    Xm = x_ref[...].astype(matmul_dtype).reshape(Bt * Lkv, dim)   # only feeds K/V matmuls

    def mm(a_f32, w_ref):  # MXU matmul: pre-cast weights, fp32 accumulation
        return jnp.dot(a_f32.astype(matmul_dtype), w_ref[...],
                       preferred_element_type=jnp.float32)

    # ---- LayerNorm(qdim): one-pass stats, fp32 elementwise ----
    inv_n = 1.0 / qdim
    s1 = jnp.sum(Qf, axis=-1, keepdims=True)
    s2 = jnp.sum(Qf * Qf, axis=-1, keepdims=True)
    mean = s1 * inv_n
    var = s2 * inv_n - mean * mean
    Qn = (Qf - mean) * jax.lax.rsqrt(var + LN_EPS) * ln_g[0] + ln_b[0]   # (Bt*Lq, qdim)

    # ---- QKV projections over the flattened (batch*seq) M dim ----
    # (1/sqrt(head_dim) already folded into wq_t / bq in prepare_params.)
    q = mm(Qn, wq_t) + bq[0]                                  # (Bt*Lq, qdim)
    k = mm(Xm, wk_t) + bk[0]                                  # (Bt*Lkv, qdim)
    v = mm(Xm, wv_t) + bv[0]                                  # (Bt*Lkv, qdim)

    q3 = q.reshape(Bt, Lq, qdim).astype(matmul_dtype)
    k3 = k.reshape(Bt, Lkv, qdim).astype(matmul_dtype)
    v3 = v.reshape(Bt, Lkv, qdim).astype(matmul_dtype)

    # ---- scaled dot-product attention, accumulated through the output proj ----
    # TODO(synk): key_padding_mask (mask != None path) is not implemented in-kernel.
    # Static head loop (n_heads is small); only one fp32 accumulator stays live.
    attn_out = jnp.zeros((Bt * Lq, qdim), jnp.float32)
    for h in range(n_heads):
        lo = h * head_dim
        qh = q3[:, :, lo:lo + head_dim]                       # (Bt, Lq, hd)
        kh = k3[:, :, lo:lo + head_dim]                       # (Bt, Lkv, hd)
        vh = v3[:, :, lo:lo + head_dim]                       # (Bt, Lkv, hd)
        s = jnp.einsum("bqd,bkd->bqk", qh, kh,
                       preferred_element_type=jnp.float32)    # (Bt, Lq, Lkv)
        s = s - jnp.max(s, axis=-1, keepdims=True)
        p = jnp.exp(s)
        denom = jnp.sum(p, axis=-1, keepdims=True)
        if approx_recip:
            p = p * pl.reciprocal(denom, approx=True)         # EUP slot (bf16 path)
        else:
            p = p / denom                                     # exact divide (fp32 path)
        oh = jnp.einsum("bqk,bkd->bqd", p.astype(matmul_dtype), vh,
                        preferred_element_type=jnp.float32)   # (Bt, Lq, hd)
        attn_out = attn_out + jnp.dot(
            oh.reshape(Bt * Lq, head_dim).astype(matmul_dtype),
            wo_t[lo:lo + head_dim, :],
            preferred_element_type=jnp.float32)               # (Bt*Lq, qdim)

    # ---- first residual (residual is the LayerNorm output, as in the PyTorch code) ----
    Q1 = Qn + attn_out + bo[0]

    # ---- FeedForward: Linear -> SELU -> Linear (elementwise kept in fp32) ----
    h1 = mm(Q1, w1_t) + b1[0]
    h1 = SELU_SCALE * jnp.where(h1 > 0, h1, SELU_ALPHA * (jnp.exp(h1) - 1.0))
    h2 = mm(h1, w2_t) + b2[0]

    out_ref[...] = (Q1 + h2).reshape(Bt, Lq, qdim).astype(out_ref.dtype)


def prepare_params(params, n_heads, matmul_dtype=jnp.bfloat16):
    """One-time weight prep: transpose matmul weights to (in, out), pre-cast them
    to the MXU dtype, fold the 1/sqrt(head_dim) scale into wq/bq, reshape biases /
    LN params to (1, N) fp32.  Done once, outside the per-call path."""
    qdim = params["wq"].shape[0]
    scale = 1.0 / math.sqrt(qdim // n_heads)
    md = jnp.dtype(matmul_dtype)

    def mat(w):   # (out, in) -> (in, out), MXU dtype
        return jnp.asarray(w).T.astype(md)

    def vec(b):   # bias / LN param, kept fp32 (added after fp32 accumulation)
        return jnp.asarray(b, jnp.float32).reshape(1, -1)

    return (
        vec(params["ln_g"]), vec(params["ln_b"]),
        mat(params["wq"] * scale), vec(params["bq"] * scale),
        mat(params["wk"]), vec(params["bk"]),
        mat(params["wv"]), vec(params["bv"]),
        mat(params["wo"]), vec(params["bo"]),
        mat(params["w1"]), vec(params["b1"]),
        mat(params["w2"]), vec(params["b2"]),
    )


def _auto_block_b(B, Lq, Lkv, qdim, dim, *, weight_bytes, io_itemsize):
    # Working-set budget ~36 MiB under an explicit 48 MiB scoped limit: safe on
    # v7x (64 MiB VMEM/TC), generous on v5e/v6e (128 MiB).
    budget = 36 * 1024 * 1024
    avail = max(budget - weight_bytes, budget // 8)   # weights are single-buffered
    per_b_io = 2 * io_itemsize * (2 * Lq * qdim + Lkv * dim)          # double-buffered in/out blocks
    # fp32 live activations per batch element (Qn/q/k/v/attn_out/Q1/h1 + per-head scores).
    per_b_act = 4 * (8 * Lq * qdim + 3 * Lkv * qdim + Lkv * dim + 2 * Lq * Lkv)
    cap = max(1, int(avail // (per_b_io + per_b_act)))
    # v7x megacore: the batch grid axis is "parallel" and v7x has 2 TensorCores,
    # so never collapse the whole batch into a single grid step when B > 1.
    if B > 1:
        cap = min(cap, max(1, B // 2))
    # Largest divisor of B within the cap (maximizes the flattened MXU M dim
    # block_b*Lq, targeting the >=256-row fill when VMEM / megacore caps allow).
    best = 1
    for d in range(1, B + 1):
        if B % d == 0 and d <= cap:
            best = d
    return best


def cross_attention_pallas(Q, x, prepared_weights, n_heads, *, block_b=None):
    B, Lq, qdim = Q.shape
    _, Lkv, dim = x.shape
    assert qdim % n_heads == 0
    weights = list(prepared_weights)
    matmul_dtype = weights[2].dtype                       # wq_t carries the MXU dtype
    approx_recip = matmul_dtype != jnp.dtype(jnp.float32)

    weight_bytes = sum(int(w.size) * w.dtype.itemsize for w in weights)
    if block_b is None:
        block_b = _auto_block_b(B, Lq, Lkv, qdim, dim,
                                weight_bytes=weight_bytes,
                                io_itemsize=Q.dtype.itemsize)
    if B % block_b != 0:
        raise ValueError(f"block_b={block_b} must divide batch {B}")
    grid = (B // block_b,)

    data_specs = [
        pl.BlockSpec((block_b, Lq, qdim), lambda b: (b, 0, 0)),
        pl.BlockSpec((block_b, Lkv, dim), lambda b: (b, 0, 0)),
    ]
    # Weights/biases have a constant block index -> never re-fetched; single-buffer
    # them to halve their VMEM residency.
    weight_specs = [
        pl.BlockSpec(w.shape, lambda b, nd=w.ndim: (0,) * nd,
                     pipeline_mode=pl.Buffered(1))
        for w in weights
    ]

    # Advisory cost estimate so XLA overlaps surrounding ops with this call.
    flops = int(B * (8 * Lq * qdim * qdim + 4 * Lkv * dim * qdim + 4 * Lq * Lkv * qdim))
    transcendentals = int(B * (n_heads * Lq * Lkv + Lq * qdim + Lq))
    bytes_accessed = int(Q.dtype.itemsize * (2 * B * Lq * qdim + B * Lkv * dim)
                         + weight_bytes)

    kernel = functools.partial(_cross_attn_kernel, n_heads=n_heads,
                               matmul_dtype=matmul_dtype,
                               approx_recip=approx_recip)
    return pl.pallas_call(
        kernel,
        out_shape=jax.ShapeDtypeStruct((B, Lq, qdim), Q.dtype),
        grid_spec=pltpu.PrefetchScalarGridSpec(
            num_scalar_prefetch=0,
            grid=grid,
            in_specs=data_specs + weight_specs,
            out_specs=pl.BlockSpec((block_b, Lq, qdim), lambda b: (b, 0, 0)),
        ),
        compiler_params=pltpu.CompilerParams(
            dimension_semantics=("parallel",),
            vmem_limit_bytes=48 * 1024 * 1024),
        cost_estimate=pl.CostEstimate(flops=flops,
                                      transcendentals=transcendentals,
                                      bytes_accessed=bytes_accessed),
    )(Q, x, *weights)


def cross_attention_ref(Q, x, params, n_heads):
    """Pure-JAX reference of the PyTorch forward (eval mode, mask=None)."""
    B, Lq, qdim = Q.shape
    hd = qdim // n_heads
    mean = jnp.mean(Q, axis=-1, keepdims=True)
    var = jnp.mean((Q - mean) ** 2, axis=-1, keepdims=True)
    Qn = (Q - mean) / jnp.sqrt(var + LN_EPS) * params["ln_g"] + params["ln_b"]
    q = Qn @ params["wq"].T + params["bq"]
    k = x @ params["wk"].T + params["bk"]
    v = x @ params["wv"].T + params["bv"]
    qh = q.reshape(B, Lq, n_heads, hd).transpose(0, 2, 1, 3) / math.sqrt(hd)
    kh = k.reshape(B, -1, n_heads, hd).transpose(0, 2, 1, 3)
    vh = v.reshape(B, -1, n_heads, hd).transpose(0, 2, 1, 3)
    s = jnp.einsum("bhqd,bhkd->bhqk", qh, kh)
    p = jax.nn.softmax(s, axis=-1)
    o = jnp.einsum("bhqk,bhkd->bhqd", p, vh).transpose(0, 2, 1, 3).reshape(B, Lq, qdim)
    attn_out = o @ params["wo"].T + params["bo"]
    Q1 = Qn + attn_out
    h1 = Q1 @ params["w1"].T + params["b1"]
    h1 = SELU_SCALE * jnp.where(h1 > 0, h1, SELU_ALPHA * (jnp.exp(h1) - 1.0))
    h2 = h1 @ params["w2"].T + params["b2"]
    return Q1 + h2


def init_params(key, dim, qdim):
    ks = jax.random.split(key, 8)

    def lin(k, out_f, in_f):
        bound = 1.0 / math.sqrt(in_f)
        return jax.random.uniform(k, (out_f, in_f), jnp.float32, -bound, bound)

    return {
        "ln_g": jnp.ones((qdim,), jnp.float32),
        "ln_b": jnp.zeros((qdim,), jnp.float32),
        "wq": lin(ks[0], qdim, qdim), "bq": jnp.zeros((qdim,), jnp.float32),
        "wk": lin(ks[1], qdim, dim),  "bk": jnp.zeros((qdim,), jnp.float32),
        "wv": lin(ks[2], qdim, dim),  "bv": jnp.zeros((qdim,), jnp.float32),
        "wo": lin(ks[3], qdim, qdim), "bo": jnp.zeros((qdim,), jnp.float32),
        "w1": lin(ks[4], qdim, qdim),
        "b1": jax.random.uniform(ks[5], (qdim,), jnp.float32,
                                 -1.0 / math.sqrt(qdim), 1.0 / math.sqrt(qdim)),
        "w2": lin(ks[6], qdim, qdim),
        "b2": jax.random.uniform(ks[7], (qdim,), jnp.float32,
                                 -1.0 / math.sqrt(qdim), 1.0 / math.sqrt(qdim)),
    }


if __name__ == "__main__":
    B, Lq, Lkv, dim, qdim, n_heads = 4, 8, 16, 16, 32, 4
    key = jax.random.PRNGKey(0)
    kq, kx, kp = jax.random.split(key, 3)
    Q = jax.random.normal(kq, (B, Lq, qdim), jnp.float32)
    x = jax.random.normal(kx, (B, Lkv, dim), jnp.float32)
    params = init_params(kp, dim, qdim)

    ref = cross_attention_ref(Q, x, params, n_heads)

    # 1) fp32 exact-semantics path: fp32 weights, exact softmax divide, explicit 2-step grid.
    prepared_f32 = prepare_params(params, n_heads, matmul_dtype=jnp.float32)
    out_f32 = jax.block_until_ready(
        cross_attention_pallas(Q, x, prepared_f32, n_heads, block_b=2))
    assert out_f32.shape == (B, Lq, qdim)
    assert jnp.allclose(out_f32, ref, rtol=5e-3, atol=5e-3), "fp32 path mismatch vs reference"

    # 2) default path: pre-cast bf16 MXU operands, fp32 accumulation, auto batch tile.
    prepared_bf16 = prepare_params(params, n_heads, matmul_dtype=jnp.bfloat16)
    out_bf16 = jax.block_until_ready(
        cross_attention_pallas(Q, x, prepared_bf16, n_heads))
    assert out_bf16.shape == (B, Lq, qdim)
    assert jnp.allclose(out_bf16, ref, rtol=2e-2, atol=2e-2), "bf16 path mismatch vs reference"

    print("KERNEL_OK")
</pallas_src>

<mosaic_0001>
module attributes {stable_mosaic.version = 11 : i64} {
  func.func @_cross_attn_kernel(%arg0: i32, %arg1: memref<2x8x32xf32, #tpu.memory_space<vmem>>, %arg2: memref<2x16x16xf32, #tpu.memory_space<vmem>>, %arg3: memref<1x32xf32, #tpu.memory_space<vmem>>, %arg4: memref<1x32xf32, #tpu.memory_space<vmem>>, %arg5: memref<32x32xf32, #tpu.memory_space<vmem>>, %arg6: memref<1x32xf32, #tpu.memory_space<vmem>>, %arg7: memref<16x32xf32, #tpu.memory_space<vmem>>, %arg8: memref<1x32xf32, #tpu.memory_space<vmem>>, %arg9: memref<16x32xf32, #tpu.memory_space<vmem>>, %arg10: memref<1x32xf32, #tpu.memory_space<vmem>>, %arg11: memref<32x32xf32, #tpu.memory_space<vmem>>, %arg12: memref<1x32xf32, #tpu.memory_space<vmem>>, %arg13: memref<32x32xf32, #tpu.memory_space<vmem>>, %arg14: memref<1x32xf32, #tpu.memory_space<vmem>>, %arg15: memref<32x32xf32, #tpu.memory_space<vmem>>, %arg16: memref<1x32xf32, #tpu.memory_space<vmem>>, %arg17: memref<2x8x32xf32, #tpu.memory_space<vmem>>) attributes {dimension_semantics = [#tpu.dimension_semantics<parallel>], iteration_bounds = array<i64: 2>, scalar_prefetch = 0 : i64, scratch_operands = 0 : i64, tpu.core_type = #tpu.core_type<tc>, window_params = [{transform_indices = @transform_0, window_bounds = array<i64: 2, 8, 32>}, {transform_indices = @transform_1, window_bounds = array<i64: 2, 16, 16>}, {pipeline_mode = #tpu.pipeline_mode<synchronous>, transform_indices = @transform_2, window_bounds = array<i64: 1, 32>}, {pipeline_mode = #tpu.pipeline_mode<synchronous>, transform_indices = @transform_3, window_bounds = array<i64: 1, 32>}, {pipeline_mode = #tpu.pipeline_mode<synchronous>, transform_indices = @transform_4, window_bounds = array<i64: 32, 32>}, {pipeline_mode = #tpu.pipeline_mode<synchronous>, transform_indices = @transform_5, window_bounds = array<i64: 1, 32>}, {pipeline_mode = #tpu.pipeline_mode<synchronous>, transform_indices = @transform_6, window_bounds = array<i64: 16, 32>}, {pipeline_mode = #tpu.pipeline_mode<synchronous>, transform_indices = @transform_7, window_bounds = array<i64: 1, 32>}, {pipeline_mode = #tpu.pipeline_mode<synchronous>, transform_indices = @transform_8, window_bounds = array<i64: 16, 32>}, {pipeline_mode = #tpu.pipeline_mode<synchronous>, transform_indices = @transform_9, window_bounds = array<i64: 1, 32>}, {pipeline_mode = #tpu.pipeline_mode<synchronous>, transform_indices = @transform_10, window_bounds = array<i64: 32, 32>}, {pipeline_mode = #tpu.pipeline_mode<synchronous>, transform_indices = @transform_11, window_bounds = array<i64: 1, 32>}, {pipeline_mode = #tpu.pipeline_mode<synchronous>, transform_indices = @transform_12, window_bounds = array<i64: 32, 32>}, {pipeline_mode = #tpu.pipeline_mode<synchronous>, transform_indices = @transform_13, window_bounds = array<i64: 1, 32>}, {pipeline_mode = #tpu.pipeline_mode<synchronous>, transform_indices = @transform_14, window_bounds = array<i64: 32, 32>}, {pipeline_mode = #tpu.pipeline_mode<synchronous>, transform_indices = @transform_15, window_bounds = array<i64: 1, 32>}, {transform_indices = @transform_16, window_bounds = array<i64: 2, 8, 32>}]} {
    %c0 = arith.constant 0 : index
    %c0_0 = arith.constant 0 : index
    %c0_1 = arith.constant 0 : index
    %0 = vector.load %arg1[%c0, %c0_0, %c0_1] : memref<2x8x32xf32, #tpu.memory_space<vmem>>, vector<2x8x32xf32>
    %1 = vector.shape_cast %0 : vector<2x8x32xf32> to vector<16x32xf32>
    %c0_2 = arith.constant 0 : index
    %c0_3 = arith.constant 0 : index
    %c0_4 = arith.constant 0 : index
    %2 = vector.load %arg2[%c0_2, %c0_3, %c0_4] : memref<2x16x16xf32, #tpu.memory_space<vmem>>, vector<2x16x16xf32>
    %3 = vector.shape_cast %2 : vector<2x16x16xf32> to vector<32x16xf32>
    %cst = arith.constant dense<0.000000e+00> : vector<16xf32>
    %4 = vector.multi_reduction <add>, %1, %cst [1] : vector<16x32xf32> to vector<16xf32>
    %5 = vector.shape_cast %4 : vector<16xf32> to vector<16x1xf32>
    %6 = arith.mulf %1, %1 : vector<16x32xf32>
    %cst_5 = arith.constant dense<0.000000e+00> : vector<16xf32>
    %7 = vector.multi_reduction <add>, %6, %cst_5 [1] : vector<16x32xf32> to vector<16xf32>
    %8 = vector.shape_cast %7 : vector<16xf32> to vector<16x1xf32>
    %cst_6 = arith.constant 3.125000e-02 : f32
    %9 = vector.broadcast %cst_6 : f32 to vector<16x1xf32>
    %10 = arith.mulf %5, %9 : vector<16x1xf32>
    %cst_7 = arith.constant 3.125000e-02 : f32
    %11 = vector.broadcast %cst_7 : f32 to vector<16x1xf32>
    %12 = arith.mulf %8, %11 : vector<16x1xf32>
    %13 = arith.mulf %10, %10 : vector<16x1xf32>
    %14 = arith.subf %12, %13 : vector<16x1xf32>
    %15 = vector.broadcast %10 : vector<16x1xf32> to vector<16x32xf32>
    %16 = arith.subf %1, %15 : vector<16x32xf32>
    %cst_8 = arith.constant 9.99999974E-6 : f32
    %17 = vector.broadcast %cst_8 : f32 to vector<16x1xf32>
    %18 = arith.addf %14, %17 : vector<16x1xf32>
    %19 = math.rsqrt %18 : vector<16x1xf32>
    %20 = vector.broadcast %19 : vector<16x1xf32> to vector<16x32xf32>
    %21 = arith.mulf %16, %20 : vector<16x32xf32>
    %c0_9 = arith.constant 0 : index
    %c0_10 = arith.constant 0 : index
    %22 = vector.load %arg3[%c0_9, %c0_10] : memref<1x32xf32, #tpu.memory_space<vmem>>, vector<1x32xf32>
    %23 = vector.shape_cast %22 : vector<1x32xf32> to vector<32xf32>
    %24 = vector.shape_cast %23 : vector<32xf32> to vector<1x32xf32>
    %25 = vector.broadcast %24 : vector<1x32xf32> to vector<16x32xf32>
    %26 = arith.mulf %21, %25 : vector<16x32xf32>
    %c0_11 = arith.constant 0 : index
    %c0_12 = arith.constant 0 : index
    %27 = vector.load %arg4[%c0_11, %c0_12] : memref<1x32xf32, #tpu.memory_space<vmem>>, vector<1x32xf32>
    %28 = vector.shape_cast %27 : vector<1x32xf32> to vector<32xf32>
    %29 = vector.shape_cast %28 : vector<32xf32> to vector<1x32xf32>
    %30 = vector.broadcast %29 : vector<1x32xf32> to vector<16x32xf32>
    %31 = arith.addf %26, %30 : vector<16x32xf32>
    %c0_13 = arith.constant 0 : index
    %c0_14 = arith.constant 0 : index
    %32 = vector.load %arg5[%c0_13, %c0_14] : memref<32x32xf32, #tpu.memory_space<vmem>>, vector<32x32xf32>
    %cst_15 = arith.constant dense<0.000000e+00> : vector<16x32xf32>
    %33 = tpu.matmul %31, %32, %cst_15 {dimension_numbers = #tpu.dot_dimension_numbers<[1], [0], [0], [1], [0, 0, 1, 1], [], []>} : vector<16x32xf32>, vector<32x32xf32>, vector<16x32xf32> -> vector<16x32xf32>
    %c0_16 = arith.constant 0 : index
    %c0_17 = arith.constant 0 : index
    %34 = vector.load %arg6[%c0_16, %c0_17] : memref<1x32xf32, #tpu.memory_space<vmem>>, vector<1x32xf32>
    %35 = vector.shape_cast %34 : vector<1x32xf32> to vector<32xf32>
    %36 = vector.shape_cast %35 : vector<32xf32> to vector<1x32xf32>
    %37 = vector.broadcast %36 : vector<1x32xf32> to vector<16x32xf32>
    %38 = arith.addf %33, %37 : vector<16x32xf32>
    %c0_18 = arith.constant 0 : index
    %c0_19 = arith.constant 0 : index
    %39 = vector.load %arg7[%c0_18, %c0_19] : memref<16x32xf32, #tpu.memory_space<vmem>>, vector<16x32xf32>
    %cst_20 = arith.constant dense<0.000000e+00> : vector<32x32xf32>
    %40 = tpu.matmul %3, %39, %cst_20 {dimension_numbers = #tpu.dot_dimension_numbers<[1], [0], [0], [1], [0, 0, 1, 1], [], []>} : vector<32x16xf32>, vector<16x32xf32>, vector<32x32xf32> -> vector<32x32xf32>
    %c0_21 = arith.constant 0 : index
    %c0_22 = arith.constant 0 : index
    %41 = vector.load %arg8[%c0_21, %c0_22] : memref<1x32xf32, #tpu.memory_space<vmem>>, vector<1x32xf32>
    %42 = vector.shape_cast %41 : vector<1x32xf32> to vector<32xf32>
    %43 = vector.shape_cast %42 : vector<32xf32> to vector<1x32xf32>
    %44 = vector.broadcast %43 : vector<1x32xf32> to vector<32x32xf32>
    %45 = arith.addf %40, %44 : vector<32x32xf32>
    %c0_23 = arith.constant 0 : index
    %c0_24 = arith.constant 0 : index
    %46 = vector.load %arg9[%c0_23, %c0_24] : memref<16x32xf32, #tpu.memory_space<vmem>>, vector<16x32xf32>
    %cst_25 = arith.constant dense<0.000000e+00> : vector<32x32xf32>
    %47 = tpu.matmul %3, %46, %cst_25 {dimension_numbers = #tpu.dot_dimension_numbers<[1], [0], [0], [1], [0, 0, 1, 1], [], []>} : vector<32x16xf32>, vector<16x32xf32>, vector<32x32xf32> -> vector<32x32xf32>
    %c0_26 = arith.constant 0 : index
    %c0_27 = arith.constant 0 : index
    %48 = vector.load %arg10[%c0_26, %c0_27] : memref<1x32xf32, #tpu.memory_space<vmem>>, vector<1x32xf32>
    %49 = vector.shape_cast %48 : vector<1x32xf32> to vector<32xf32>
    %50 = vector.shape_cast %49 : vector<32xf32> to vector<1x32xf32>
    %51 = vector.broadcast %50 : vector<1x32xf32> to vector<32x32xf32>
    %52 = arith.addf %47, %51 : vector<32x32xf32>
    %53 = vector.shape_cast %38 : vector<16x32xf32> to vector<2x8x32xf32>
    %54 = vector.shape_cast %45 : vector<32x32xf32> to vector<2x16x32xf32>
    %55 = vector.shape_cast %52 : vector<32x32xf32> to vector<2x16x32xf32>
    %cst_28 = arith.constant 0.000000e+00 : f32
    %56 = vector.broadcast %cst_28 : f32 to vector<16x32xf32>
    %57 = vector.extract_strided_slice %53 {offsets = [0, 0, 0], sizes = [2, 8, 8], strides = [1, 1, 1]} : vector<2x8x32xf32> to vector<2x8x8xf32>
    %58 = vector.extract_strided_slice %54 {offsets = [0, 0, 0], sizes = [2, 16, 8], strides = [1, 1, 1]} : vector<2x16x32xf32> to vector<2x16x8xf32>
    %59 = vector.extract_strided_slice %55 {offsets = [0, 0, 0], sizes = [2, 16, 8], strides = [1, 1, 1]} : vector<2x16x32xf32> to vector<2x16x8xf32>
    "tpu.trace_start"() <{level = 10 : i32, message = "bqd,bkd->bqk"}> : () -> ()
    %cst_29 = arith.constant dense<0.000000e+00> : vector<2x8x16xf32>
    %60 = tpu.matmul %57, %58, %cst_29 {dimension_numbers = #tpu.dot_dimension_numbers<[2], [2], [1], [1], [0, 0, 0, 1, 1, 1], [0], [0]>} : vector<2x8x8xf32>, vector<2x16x8xf32>, vector<2x8x16xf32> -> vector<2x8x16xf32>
    "tpu.trace_stop"() : () -> ()
    %cst_30 = arith.constant dense<0xFF800000> : vector<2x8xf32>
    %61 = vector.multi_reduction <maximumf>, %60, %cst_30 [2] : vector<2x8x16xf32> to vector<2x8xf32>
    %62 = vector.shape_cast %61 : vector<2x8xf32> to vector<2x8x1xf32>
    %63 = vector.broadcast %62 : vector<2x8x1xf32> to vector<2x8x16xf32>
    %64 = arith.subf %60, %63 : vector<2x8x16xf32>
    %65 = math.exp %64 : vector<2x8x16xf32>
    %cst_31 = arith.constant dense<0.000000e+00> : vector<2x8xf32>
    %66 = vector.multi_reduction <add>, %65, %cst_31 [2] : vector<2x8x16xf32> to vector<2x8xf32>
    %67 = vector.shape_cast %66 : vector<2x8xf32> to vector<2x8x1xf32>
    %68 = vector.broadcast %67 : vector<2x8x1xf32> to vector<2x8x16xf32>
    %69 = arith.divf %65, %68 : vector<2x8x16xf32>
    "tpu.trace_start"() <{level = 10 : i32, message = "bqk,bkd->bqd"}> : () -> ()
    %cst_32 = arith.constant dense<0.000000e+00> : vector<2x8x8xf32>
    %70 = tpu.matmul %69, %59, %cst_32 {dimension_numbers = #tpu.dot_dimension_numbers<[2], [1], [1], [2], [0, 0, 0, 1, 1, 2], [0], [0]>} : vector<2x8x16xf32>, vector<2x16x8xf32>, vector<2x8x8xf32> -> vector<2x8x8xf32>
    "tpu.trace_stop"() : () -> ()
    %71 = vector.shape_cast %70 : vector<2x8x8xf32> to vector<16x8xf32>
    %c0_33 = arith.constant 0 : index
    %c0_34 = arith.constant 0 : index
    %72 = vector.load %arg11[%c0_33, %c0_34] : memref<32x32xf32, #tpu.memory_space<vmem>>, vector<8x32xf32>
    %cst_35 = arith.constant dense<0.000000e+00> : vector<16x32xf32>
    %73 = tpu.matmul %71, %72, %cst_35 {dimension_numbers = #tpu.dot_dimension_numbers<[1], [0], [0], [1], [0, 0, 1, 1], [], []>} : vector<16x8xf32>, vector<8x32xf32>, vector<16x32xf32> -> vector<16x32xf32>
    %74 = arith.addf %56, %73 : vector<16x32xf32>
    %75 = vector.extract_strided_slice %53 {offsets = [0, 0, 8], sizes = [2, 8, 8], strides = [1, 1, 1]} : vector<2x8x32xf32> to vector<2x8x8xf32>
    %76 = vector.extract_strided_slice %54 {offsets = [0, 0, 8], sizes = [2, 16, 8], strides = [1, 1, 1]} : vector<2x16x32xf32> to vector<2x16x8xf32>
    %77 = vector.extract_strided_slice %55 {offsets = [0, 0, 8], sizes = [2, 16, 8], strides = [1, 1, 1]} : vector<2x16x32xf32> to vector<2x16x8xf32>
    "tpu.trace_start"() <{level = 10 : i32, message = "bqd,bkd->bqk"}> : () -> ()
    %cst_36 = arith.constant dense<0.000000e+00> : vector<2x8x16xf32>
    %78 = tpu.matmul %75, %76, %cst_36 {dimension_numbers = #tpu.dot_dimension_numbers<[2], [2], [1], [1], [0, 0, 0, 1, 1, 1], [0], [0]>} : vector<2x8x8xf32>, vector<2x16x8xf32>, vector<2x8x16xf32> -> vector<2x8x16xf32>
    "tpu.trace_stop"() : () -> ()
    %cst_37 = arith.constant dense<0xFF800000> : vector<2x8xf32>
    %79 = vector.multi_reduction <maximumf>, %78, %cst_37 [2] : vector<2x8x16xf32> to vector<2x8xf32>
    %80 = vector.shape_cast %79 : vector<2x8xf32> to vector<2x8x1xf32>
    %81 = vector.broadcast %80 : vector<2x8x1xf32> to vector<2x8x16xf32>
    %82 = arith.subf %78, %81 : vector<2x8x16xf32>
    %83 = math.exp %82 : vector<2x8x16xf32>
    %cst_38 = arith.constant dense<0.000000e+00> : vector<2x8xf32>
    %84 = vector.multi_reduction <add>, %83, %cst_38 [2] : vector<2x8x16xf32> to vector<2x8xf32>
    %85 = vector.shape_cast %84 : vector<2x8xf32> to vector<2x8x1xf32>
    %86 = vector.broadcast %85 : vector<2x8x1xf32> to vector<2x8x16xf32>
    %87 = arith.divf %83, %86 : vector<2x8x16xf32>
    "tpu.trace_start"() <{level = 10 : i32, message = "bqk,bkd->bqd"}> : () -> ()
    %cst_39 = arith.constant dense<0.000000e+00> : vector<2x8x8xf32>
    %88 = tpu.matmul %87, %77, %cst_39 {dimension_numbers = #tpu.dot_dimension_numbers<[2], [1], [1], [2], [0, 0, 0, 1, 1, 2], [0], [0]>} : vector<2x8x16xf32>, vector<2x16x8xf32>, vector<2x8x8xf32> -> vector<2x8x8xf32>
    "tpu.trace_stop"() : () -> ()
    %89 = vector.shape_cast %88 : vector<2x8x8xf32> to vector<16x8xf32>
    %c8 = arith.constant 8 : index
    %c0_40 = arith.constant 0 : index
    %90 = vector.load %arg11[%c8, %c0_40] : memref<32x32xf32, #tpu.memory_space<vmem>>, vector<8x32xf32>
    %cst_41 = arith.constant dense<0.000000e+00> : vector<16x32xf32>
    %91 = tpu.matmul %89, %90, %cst_41 {dimension_numbers = #tpu.dot_dimension_numbers<[1], [0], [0], [1], [0, 0, 1, 1], [], []>} : vector<16x8xf32>, vector<8x32xf32>, vector<16x32xf32> -> vector<16x32xf32>
    %92 = arith.addf %74, %91 : vector<16x32xf32>
    %93 = vector.extract_strided_slice %53 {offsets = [0, 0, 16], sizes = [2, 8, 8], strides = [1, 1, 1]} : vector<2x8x32xf32> to vector<2x8x8xf32>
    %94 = vector.extract_strided_slice %54 {offsets = [0, 0, 16], sizes = [2, 16, 8], strides = [1, 1, 1]} : vector<2x16x32xf32> to vector<2x16x8xf32>
    %95 = vector.extract_strided_slice %55 {offsets = [0, 0, 16], sizes = [2, 16, 8], strides = [1, 1, 1]} : vector<2x16x32xf32> to vector<2x16x8xf32>
    "tpu.trace_start"() <{level = 10 : i32, message = "bqd,bkd->bqk"}> : () -> ()
    %cst_42 = arith.constant dense<0.000000e+00> : vector<2x8x16xf32>
    %96 = tpu.matmul %93, %94, %cst_42 {dimension_numbers = #tpu.dot_dimension_numbers<[2], [2], [1], [1], [0, 0, 0, 1, 1, 1], [0], [0]>} : vector<2x8x8xf32>, vector<2x16x8xf32>, vector<2x8x16xf32> -> vector<2x8x16xf32>
    "tpu.trace_stop"() : () -> ()
    %cst_43 = arith.constant dense<0xFF800000> : vector<2x8xf32>
    %97 = vector.multi_reduction <maximumf>, %96, %cst_43 [2] : vector<2x8x16xf32> to vector<2x8xf32>
    %98 = vector.shape_cast %97 : vector<2x8xf32> to vector<2x8x1xf32>
    %99 = vector.broadcast %98 : vector<2x8x1xf32> to vector<2x8x16xf32>
    %100 = arith.subf %96, %99 : vector<2x8x16xf32>
    %101 = math.exp %100 : vector<2x8x16xf32>
    %cst_44 = arith.constant dense<0.000000e+00> : vector<2x8xf32>
    %102 = vector.multi_reduction <add>, %101, %cst_44 [2] : vector<2x8x16xf32> to vector<2x8xf32>
    %103 = vector.shape_cast %102 : vector<2x8xf32> to vector<2x8x1xf32>
    %104 = vector.broadcast %103 : vector<2x8x1xf32> to vector<2x8x16xf32>
    %105 = arith.divf %101, %104 : vector<2x8x16xf32>
    "tpu.trace_start"() <{level = 10 : i32, message = "bqk,bkd->bqd"}> : () -> ()
    %cst_45 = arith.constant dense<0.000000e+00> : vector<2x8x8xf32>
    %106 = tpu.matmul %105, %95, %cst_45 {dimension_numbers = #tpu.dot_dimension_numbers<[2], [1], [1], [2], [0, 0, 0, 1, 1, 2], [0], [0]>} : vector<2x8x16xf32>, vector<2x16x8xf32>, vector<2x8x8xf32> -> vector<2x8x8xf32>
    "tpu.trace_stop"() : () -> ()
    %107 = vector.shape_cast %106 : vector<2x8x8xf32> to vector<16x8xf32>
    %c16 = arith.constant 16 : index
    %c0_46 = arith.constant 0 : index
    %108 = vector.load %arg11[%c16, %c0_46] : memref<32x32xf32, #tpu.memory_space<vmem>>, vector<8x32xf32>
    %cst_47 = arith.constant dense<0.000000e+00> : vector<16x32xf32>
    %109 = tpu.matmul %107, %108, %cst_47 {dimension_numbers = #tpu.dot_dimension_numbers<[1], [0], [0], [1], [0, 0, 1, 1], [], []>} : vector<16x8xf32>, vector<8x32xf32>, vector<16x32xf32> -> vector<16x32xf32>
    %110 = arith.addf %92, %109 : vector<16x32xf32>
    %111 = vector.extract_strided_slice %53 {offsets = [0, 0, 24], sizes = [2, 8, 8], strides = [1, 1, 1]} : vector<2x8x32xf32> to vector<2x8x8xf32>
    %112 = vector.extract_strided_slice %54 {offsets = [0, 0, 24], sizes = [2, 16, 8], strides = [1, 1, 1]} : vector<2x16x32xf32> to vector<2x16x8xf32>
    %113 = vector.extract_strided_slice %55 {offsets = [0, 0, 24], sizes = [2, 16, 8], strides = [1, 1, 1]} : vector<2x16x32xf32> to vector<2x16x8xf32>
    "tpu.trace_start"() <{level = 10 : i32, message = "bqd,bkd->bqk"}> : () -> ()
    %cst_48 = arith.constant dense<0.000000e+00> : vector<2x8x16xf32>
    %114 = tpu.matmul %111, %112, %cst_48 {dimension_numbers = #tpu.dot_dimension_numbers<[2], [2], [1], [1], [0, 0, 0, 1, 1, 1], [0], [0]>} : vector<2x8x8xf32>, vector<2x16x8xf32>, vector<2x8x16xf32> -> vector<2x8x16xf32>
    "tpu.trace_stop"() : () -> ()
    %cst_49 = arith.constant dense<0xFF800000> : vector<2x8xf32>
    %115 = vector.multi_reduction <maximumf>, %114, %cst_49 [2] : vector<2x8x16xf32> to vector<2x8xf32>
    %116 = vector.shape_cast %115 : vector<2x8xf32> to vector<2x8x1xf32>
    %117 = vector.broadcast %116 : vector<2x8x1xf32> to vector<2x8x16xf32>
    %118 = arith.subf %114, %117 : vector<2x8x16xf32>
    %119 = math.exp %118 : vector<2x8x16xf32>
    %cst_50 = arith.constant dense<0.000000e+00> : vector<2x8xf32>
    %120 = vector.multi_reduction <add>, %119, %cst_50 [2] : vector<2x8x16xf32> to vector<2x8xf32>
    %121 = vector.shape_cast %120 : vector<2x8xf32> to vector<2x8x1xf32>
    %122 = vector.broadcast %121 : vector<2x8x1xf32> to vector<2x8x16xf32>
    %123 = arith.divf %119, %122 : vector<2x8x16xf32>
    "tpu.trace_start"() <{level = 10 : i32, message = "bqk,bkd->bqd"}> : () -> ()
    %cst_51 = arith.constant dense<0.000000e+00> : vector<2x8x8xf32>
    %124 = tpu.matmul %123, %113, %cst_51 {dimension_numbers = #tpu.dot_dimension_numbers<[2], [1], [1], [2], [0, 0, 0, 1, 1, 2], [0], [0]>} : vector<2x8x16xf32>, vector<2x16x8xf32>, vector<2x8x8xf32> -> vector<2x8x8xf32>
    "tpu.trace_stop"() : () -> ()
    %125 = vector.shape_cast %124 : vector<2x8x8xf32> to vector<16x8xf32>
    %c24 = arith.constant 24 : index
    %c0_52 = arith.constant 0 : index
    %126 = vector.load %arg11[%c24, %c0_52] : memref<32x32xf32, #tpu.memory_space<vmem>>, vector<8x32xf32>
    %cst_53 = arith.constant dense<0.000000e+00> : vector<16x32xf32>
    %127 = tpu.matmul %125, %126, %cst_53 {dimension_numbers = #tpu.dot_dimension_numbers<[1], [0], [0], [1], [0, 0, 1, 1], [], []>} : vector<16x8xf32>, vector<8x32xf32>, vector<16x32xf32> -> vector<16x32xf32>
    %128 = arith.addf %110, %127 : vector<16x32xf32>
    %129 = arith.addf %31, %128 : vector<16x32xf32>
    %c0_54 = arith.constant 0 : index
    %c0_55 = arith.constant 0 : index
    %130 = vector.load %arg12[%c0_54, %c0_55] : memref<1x32xf32, #tpu.memory_space<vmem>>, vector<1x32xf32>
    %131 = vector.shape_cast %130 : vector<1x32xf32> to vector<32xf32>
    %132 = vector.shape_cast %131 : vector<32xf32> to vector<1x32xf32>
    %133 = vector.broadcast %132 : vector<1x32xf32> to vector<16x32xf32>
    %134 = arith.addf %129, %133 : vector<16x32xf32>
    %c0_56 = arith.constant 0 : index
    %c0_57 = arith.constant 0 : index
    %135 = vector.load %arg13[%c0_56, %c0_57] : memref<32x32xf32, #tpu.memory_space<vmem>>, vector<32x32xf32>
    %cst_58 = arith.constant dense<0.000000e+00> : vector<16x32xf32>
    %136 = tpu.matmul %134, %135, %cst_58 {dimension_numbers = #tpu.dot_dimension_numbers<[1], [0], [0], [1], [0, 0, 1, 1], [], []>} : vector<16x32xf32>, vector<32x32xf32>, vector<16x32xf32> -> vector<16x32xf32>
    %c0_59 = arith.constant 0 : index
    %c0_60 = arith.constant 0 : index
    %137 = vector.load %arg14[%c0_59, %c0_60] : memref<1x32xf32, #tpu.memory_space<vmem>>, vector<1x32xf32>
    %138 = vector.shape_cast %137 : vector<1x32xf32> to vector<32xf32>
    %139 = vector.shape_cast %138 : vector<32xf32> to vector<1x32xf32>
    %140 = vector.broadcast %139 : vector<1x32xf32> to vector<16x32xf32>
    %141 = arith.addf %136, %140 : vector<16x32xf32>
    %cst_61 = arith.constant 0.000000e+00 : f32
    %142 = vector.broadcast %cst_61 : f32 to vector<16x32xf32>
    %143 = arith.cmpf ogt, %141, %142 : vector<16x32xf32>
    %144 = math.exp %141 : vector<16x32xf32>
    %cst_62 = arith.constant 1.000000e+00 : f32
    %145 = vector.broadcast %cst_62 : f32 to vector<16x32xf32>
    %146 = arith.subf %144, %145 : vector<16x32xf32>
    %cst_63 = arith.constant 1.67326319 : f32
    %147 = vector.broadcast %cst_63 : f32 to vector<16x32xf32>
    %148 = arith.mulf %147, %146 : vector<16x32xf32>
    %149 = arith.select %143, %141, %148 : vector<16x32xi1>, vector<16x32xf32>
    %cst_64 = arith.constant 1.05070102 : f32
    %150 = vector.broadcast %cst_64 : f32 to vector<16x32xf32>
    %151 = arith.mulf %150, %149 : vector<16x32xf32>
    %c0_65 = arith.constant 0 : index
    %c0_66 = arith.constant 0 : index
    %152 = vector.load %arg15[%c0_65, %c0_66] : memref<32x32xf32, #tpu.memory_space<vmem>>, vector<32x32xf32>
    %cst_67 = arith.constant dense<0.000000e+00> : vector<16x32xf32>
    %153 = tpu.matmul %151, %152, %cst_67 {dimension_numbers = #tpu.dot_dimension_numbers<[1], [0], [0], [1], [0, 0, 1, 1], [], []>} : vector<16x32xf32>, vector<32x32xf32>, vector<16x32xf32> -> vector<16x32xf32>
    %c0_68 = arith.constant 0 : index
    %c0_69 = arith.constant 0 : index
    %154 = vector.load %arg16[%c0_68, %c0_69] : memref<1x32xf32, #tpu.memory_space<vmem>>, vector<1x32xf32>
    %155 = vector.shape_cast %154 : vector<1x32xf32> to vector<32xf32>
    %156 = vector.shape_cast %155 : vector<32xf32> to vector<1x32xf32>
    %157 = vector.broadcast %156 : vector<1x32xf32> to vector<16x32xf32>
    %158 = arith.addf %153, %157 : vector<16x32xf32>
    %159 = arith.addf %134, %158 : vector<16x32xf32>
    %160 = vector.shape_cast %159 : vector<16x32xf32> to vector<2x8x32xf32>
    %c0_70 = arith.constant 0 : index
    %c0_71 = arith.constant 0 : index
    %c0_72 = arith.constant 0 : index
    %161 = vector.load %arg17[%c0_70, %c0_71, %c0_72] : memref<2x8x32xf32, #tpu.memory_space<vmem>>, vector<2x8x32xf32>
    tpu.vector_store %arg17[%c0_70, %c0_71, %c0_72], %160 {strides = array<i32>} : memref<2x8x32xf32, #tpu.memory_space<vmem>>, vector<2x8x32xf32>,
    return
  }
  func.func @transform_0(%arg0: i32) -> (i32, i32, i32) {
    %c0_i32 = arith.constant 0 : i32
    %c0_i32_0 = arith.constant 0 : i32
    %c0_i32_1 = arith.constant 0 : i32
    return %arg0, %c0_i32, %c0_i32_0 : i32, i32, i32
  }
  func.func @transform_1(%arg0: i32) -> (i32, i32, i32) {
    %c0_i32 = arith.constant 0 : i32
    %c0_i32_0 = arith.constant 0 : i32
    %c0_i32_1 = arith.constant 0 : i32
    return %arg0, %c0_i32, %c0_i32_0 : i32, i32, i32
  }
  func.func @transform_2(%arg0: i32) -> (i32, i32) {
    %c0_i32 = arith.constant 0 : i32
    %c0_i32_0 = arith.constant 0 : i32
    %c0_i32_1 = arith.constant 0 : i32
    return %c0_i32, %c0_i32_0 : i32, i32
  }
  func.func @transform_3(%arg0: i32) -> (i32, i32) {
    %c0_i32 = arith.constant 0 : i32
    %c0_i32_0 = arith.constant 0 : i32
    %c0_i32_1 = arith.constant 0 : i32
    return %c0_i32, %c0_i32_0 : i32, i32
  }
  func.func @transform_4(%arg0: i32) -> (i32, i32) {
    %c0_i32 = arith.constant 0 : i32
    %c0_i32_0 = arith.constant 0 : i32
    %c0_i32_1 = arith.constant 0 : i32
    return %c0_i32, %c0_i32_0 : i32, i32
  }
  func.func @transform_5(%arg0: i32) -> (i32, i32) {
    %c0_i32 = arith.constant 0 : i32
    %c0_i32_0 = arith.constant 0 : i32
    %c0_i32_1 = arith.constant 0 : i32
    return %c0_i32, %c0_i32_0 : i32, i32
  }
  func.func @transform_6(%arg0: i32) -> (i32, i32) {
    %c0_i32 = arith.constant 0 : i32
    %c0_i32_0 = arith.constant 0 : i32
    %c0_i32_1 = arith.constant 0 : i32
    return %c0_i32, %c0_i32_0 : i32, i32
  }
  func.func @transform_7(%arg0: i32) -> (i32, i32) {
    %c0_i32 = arith.constant 0 : i32
    %c0_i32_0 = arith.constant 0 : i32
    %c0_i32_1 = arith.constant 0 : i32
    return %c0_i32, %c0_i32_0 : i32, i32
  }
  func.func @transform_8(%arg0: i32) -> (i32, i32) {
    %c0_i32 = arith.constant 0 : i32
    %c0_i32_0 = arith.constant 0 : i32
    %c0_i32_1 = arith.constant 0 : i32
    return %c0_i32, %c0_i32_0 : i32, i32
  }
  func.func @transform_9(%arg0: i32) -> (i32, i32) {
    %c0_i32 = arith.constant 0 : i32
    %c0_i32_0 = arith.constant 0 : i32
    %c0_i32_1 = arith.constant 0 : i32
    return %c0_i32, %c0_i32_0 : i32, i32
  }
  func.func @transform_10(%arg0: i32) -> (i32, i32) {
    %c0_i32 = arith.constant 0 : i32
    %c0_i32_0 = arith.constant 0 : i32
    %c0_i32_1 = arith.constant 0 : i32
    return %c0_i32, %c0_i32_0 : i32, i32
  }
  func.func @transform_11(%arg0: i32) -> (i32, i32) {
    %c0_i32 = arith.constant 0 : i32
    %c0_i32_0 = arith.constant 0 : i32
    %c0_i32_1 = arith.constant 0 : i32
    return %c0_i32, %c0_i32_0 : i32, i32
  }
  func.func @transform_12(%arg0: i32) -> (i32, i32) {
    %c0_i32 = arith.constant 0 : i32
    %c0_i32_0 = arith.constant 0 : i32
    %c0_i32_1 = arith.constant 0 : i32
    return %c0_i32, %c0_i32_0 : i32, i32
  }
  func.func @transform_13(%arg0: i32) -> (i32, i32) {
    %c0_i32 = arith.constant 0 : i32
    %c0_i32_0 = arith.constant 0 : i32
    %c0_i32_1 = arith.constant 0 : i32
    return %c0_i32, %c0_i32_0 : i32, i32
  }
  func.func @transform_14(%arg0: i32) -> (i32, i32) {
    %c0_i32 = arith.constant 0 : i32
    %c0_i32_0 = arith.constant 0 : i32
    %c0_i32_1 = arith.constant 0 : i32
    return %c0_i32, %c0_i32_0 : i32, i32
  }
  func.func @transform_15(%arg0: i32) -> (i32, i32) {
    %c0_i32 = arith.constant 0 : i32
    %c0_i32_0 = arith.constant 0 : i32
    %c0_i32_1 = arith.constant 0 : i32
    return %c0_i32, %c0_i32_0 : i32, i32
  }
  func.func @transform_16(%arg0: i32) -> (i32, i32, i32) {
    %c0_i32 = arith.constant 0 : i32
    %c0_i32_0 = arith.constant 0 : i32
    %c0_i32_1 = arith.constant 0 : i32
    return %arg0, %c0_i32, %c0_i32_0 : i32, i32, i32
  }
}

</mosaic_0001>

<bundles_post_ra>
// kernel: tpu_custom_call.1
= control target key start
LH: loop header
LB: loop body
LE: loop exit
PB: predicated region body
PF: predicated region fallthrough
CT: control target
= control target key end

     0   :  { %s3117_s0 = inlined_call_operand.hbm [shape: f32[4,8,32], index: 0, kind: input, shape index: {}]   ;;  %s3118_s1 = inlined_call_operand.hbm [shape: f32[4,16,16], index: 1, kind: input, shape index: {}]   ;;  %s3119_s2 = inlined_call_operand.vmem [shape: f32[1,32], index: 2, kind: input, shape index: {}]   ;;  %s3120_s3 = inlined_call_operand.vmem [shape: f32[1,32], index: 3, kind: input, shape index: {}]   ;;  %s3121_s4 = inlined_call_operand.hbm [shape: f32[32,32], index: 4, kind: input, shape index: {}]   ;;  %s3122_s5 = inlined_call_operand.vmem [shape: f32[1,32], index: 5, kind: input, shape index: {}]   ;;  %s3123_s6 = inlined_call_operand.hbm [shape: f32[16,32], index: 6, kind: input, shape index: {}]   ;;  %s3124_s7 = inlined_call_operand.vmem [shape: f32[1,32], index: 7, kind: input, shape index: {}]   ;;  %s3125_s8 = inlined_call_operand.hbm [shape: f32[16,32], index: 8, kind: input, shape index: {}]   ;;  %s3126_s9 = inlined_call_operand.vmem [shape: f32[1,32], index: 9, kind: input, shape index: {}]   ;;  %s3127_s10 = inlined_call_operand.hbm [shape: f32[32,32], index: 10, kind: input, shape index: {}]   ;;  %s3128_s11 = inlined_call_operand.vmem [shape: f32[1,32], index: 11, kind: input, shape index: {}]   ;;  %s3129_s12 = inlined_call_operand.hbm [shape: f32[32,32], index: 12, kind: input, shape index: {}]   ;;  %s3130_s13 = inlined_call_operand.vmem [shape: f32[1,32], index: 13, kind: input, shape index: {}]   ;;  %s3131_s14 = inlined_call_operand.hbm [shape: f32[32,32], index: 14, kind: input, shape index: {}]   ;;  %s3132_s15 = inlined_call_operand.vmem [shape: f32[1,32], index: 15, kind: input, shape index: {}]   ;;  %s3133_s16 = inlined_call_operand.hbm [shape: f32[4,8,32], index: 16, kind: output, shape index: {}]  }
   0x1   :  { %3147 = sst [smem:[#allocation30_spill]] %s3117_s0 }
   0x2   :  { %3148 = sst [smem:[#allocation31_spill]] %s3121_s4 }
   0x3   :  { %3149 = sst [smem:[#allocation32_spill]] %s3123_s6 }
   0x4   :  { %3150 = sst [smem:[#allocation33_spill]] %s3125_s8 }
   0x5   :  { %3151 = sst [smem:[#allocation34_spill]] %s3127_s10 }
   0x6   :  { %3152 = sst [smem:[#allocation35_spill]] %s3129_s12 }
   0x7   :  { %3153 = sst [smem:[#allocation36_spill]] %s3130_s13 }
   0x8   :  { %3154 = sst [smem:[#allocation37_spill]] %s3131_s14 }
   0x9   :  { %3155 = sst [smem:[#allocation38_spill]] %s3132_s15 }
   0xa   :  { %3156 = sst [smem:[#allocation39_spill]] %s3133_s16 }
   0xb   :  { %21 = vsyncpa [#allocation3], 0 }
   0xc   :  { %23 = vsyncpa [#allocation3 + $0x1], 0 }
   0xd   :  { %24 = vsyncpa [#allocation6], 0 }
   0xe   :  { %26 = vsyncpa [#allocation6 + $0x1], 0 }
   0xf   :  { %27 = vsyncpa [#allocation9], 0 }
  0x10   :  { %28 = vsyncpa [#allocation12], 0 }
  0x11   :  { %29 = vsyncpa [#allocation15], 0 }
  0x12   :  { %30 = vsyncpa [#allocation4], 0 }
  0x13   :  { %32 = vsyncpa [#allocation4 + $0x1], 0  ;;  %s2652_s21 = smov 0   ;;  %s2654_s22 = smov 0  }
  0x14   :  { %s2656_s23 = smov 0   ;;  %s2658_s24 = smov 0  }
  0x15 LB: > { %3157 = sst [smem:[#allocation24_spill]] %s2540_s21  ;;  %s2676_s28 = sadd.s32 4294967295, %s2552_s24   ;;  %s2552_s24 = sphi %s2658_s24, %s3186_s24   ;;  %s2548_s23 = sphi %s2656_s23, %s3188_s23   ;;  %s2544_s22 = sphi %s2654_s22, %s3190_s22   ;;  %s2540_s21 = sphi %s2652_s21, %s3189_s21  }
  0x16   : > { %3158 = sst [smem:[#allocation25_spill]] %s2548_s23  ;;  %p1935_p0 = scmp.ge.s32.totalorder %s2552_s24, 1 }
  0x17   : > { %s3159_s4 = sld [smem:[#allocation31_spill]]  ;;  %p59_p1 = scmp.eq.s32.totalorder %s2676_s28, 0 }
  0x18   : > { %p415_p2 = scmp.lt.s32.totalorder %s2552_s24, 3  ;;  %s2554_s30 = smov [#allocation7]  }
  0x19   : > { %s434_s0 = sshll.u32 %s2554_s30, 4  ;;  %s3161_s6 = sld [smem:[#allocation32_spill]]  ;;  %s435_s0 = int_to_ptr.vmem [resolvable:$true] %s434_s0 }
  0x1a   : > { %p2681_p3 = pnand %p1935_p0, %p415_p2  ;;  %s3163_s10 = sld [smem:[#allocation34_spill]] }
  0x1b   : > { %s3136_s15 = smov 128   ;;  %s3138_s13 = smov 8  }
  0x1c   : > { %p2059_p4 = pneg %p2681_p3  ;;  %s3164_s8 = sld [smem:[#allocation33_spill]] }
  0x1d   : > { %s432_s27 = sshll.u32 %s3159_s4, 4  ;;  %s2555_s4 = smov [#allocation8]   ;;  %s433_s27 = int_to_ptr.hbm [resolvable:$true] %s432_s27 }
  0x1e   : > { %p2693_p6 = pnand %p2059_p4, %p59_p1  ;;  %s451_s16 = sshll.u32 %s2555_s4, 4  ;;  %s452_s16 = int_to_ptr.vmem [resolvable:$true] %s451_s16 }
  0x1f   : > { %s449_s19 = sshll.u32 %s3161_s6, 4  ;;  %s2558_s4 = smov [#allocation11]   ;;  %s450_s19 = int_to_ptr.hbm [resolvable:$true] %s449_s19 }
  0x20   : > { %s483_s30 = sshll.u32 %s3163_s10, 4  ;;  %s485_s26 = sshll.u32 %s2558_s4, 4  ;;  %s484_s30 = int_to_ptr.hbm [resolvable:$true] %s483_s30  ;;  %s486_s26 = int_to_ptr.vmem [resolvable:$true] %s485_s26 }
  0x21   : > { %2062 = dma.hbm_to_vmem [thread:$0]  (!%p2693_p6), %s433_s27, 512, %s435_s0, [#allocation6], %s3136_s15, %s3136_s15, %s3138_s13  }
  0x22   : > { %2065 = dma.hbm_to_vmem [thread:$0]  (!%p2693_p6), %s450_s19, 256, %s452_s16, [#allocation9], %s3136_s15, %s3136_s15, %s3138_s13  }
  0x23   : > { %s466_s25 = sshll.u32 %s3164_s8, 4  ;;  %s2559_s27 = smov [#allocation10]   ;;  %s467_s25 = int_to_ptr.hbm [resolvable:$true] %s466_s25 }
  0x24   : > { %2071 = dma.hbm_to_vmem [thread:$0]  (!%p2693_p6), %s484_s30, 512, %s486_s26, [#allocation12], %s3136_s15, %s3136_s15, %s3138_s13  }
  0x25   : > { %s468_s0 = sshll.u32 %s2559_s27, 4  ;;  %s3165_s12 = sld [smem:[#allocation35_spill]]  ;;  %s469_s0 = int_to_ptr.vmem [resolvable:$true] %s468_s0 }
  0x26   : > { %2068 = dma.hbm_to_vmem [thread:$0]  (!%p2693_p6), %s467_s25, 256, %s469_s0, [#allocation9], %s3136_s15, %s3136_s15, %s3138_s13  }
  0x27   : > { %s3166_s14 = sld [smem:[#allocation37_spill]]  ;;  %s2560_s4 = smov [#allocation13]  }
  0x28   : > { %s502_s6 = sshll.u32 %s2560_s4, 4  ;;  %s2561_s25 = smov [#allocation14]   ;;  %s503_s6 = int_to_ptr.vmem [resolvable:$true] %s502_s6 }
  0x29   : > { %s519_s26 = sshll.u32 %s2561_s25, 4  ;;  %s1934_s27 = sadd.s32 4294967294, %s2552_s24   ;;  %s520_s26 = int_to_ptr.vmem [resolvable:$true] %s519_s26 }
  0x2a   : > { %s2741_s0 = sadd.s32 1, %s2552_s24   ;;  %s45_s17 = sadd.s32 1, %s2548_s23 }
  0x2b   : > { %s500_s19 = sshll.u32 %s3165_s12, 4  ;;  %3167 = sst [smem:[#allocation26_spill]] %s2741_s0  ;;  %s501_s19 = int_to_ptr.hbm [resolvable:$true] %s500_s19 }
  0x2c   : > { %2074 = dma.hbm_to_vmem [thread:$0]  (!%p2693_p6), %s501_s19, 512, %s503_s6, [#allocation12], %s3136_s15, %s3136_s15, %s3138_s13  }
  0x2d   : > { %s517_s18 = sshll.u32 %s3166_s14, 4  ;;  %s42_s16 = ssub.s32 %s2552_s24, %s2741_s0  ;;  %s518_s18 = int_to_ptr.hbm [resolvable:$true] %s517_s18 }
  0x2e   : > { %2077 = dma.hbm_to_vmem [thread:$0]  (!%p2693_p6), %s518_s18, 512, %s520_s26, [#allocation15], %s3136_s15, %s3136_s15, %s3138_s13  }
  0x2f   : > { %p43_p7 = scmp.eq.s32.totalorder %s42_s16, 0  ;;  %p52_p8 = scmp.ne.s32.totalorder %s2548_s23, %s2544_s22 }
  0x30   : > { %p53_p9 = scmp.eq.s32.totalorder %s2552_s24, 0  ;;  %p58_p10 = scmp.ne.s32.totalorder %s2544_s22, %s2540_s21 }
  0x31   : > { %s2752_s19 = scalar_select %p43_p7, %s2548_s23, %s45_s17  }
  0x32   : > { %p2754_p11 = por %p53_p9, %p52_p8  ;;  %p2760_p12 = por %p59_p1, %p58_p10 }
  0x33   : > { %3168 = sst [smem:[#allocation27_spill]] %s2752_s19  ;;  %p402_p13 = scmp.eq.s32.totalorder %s2676_s28, 1 }
  0x34   : > { %p408_p0 = scmp.eq.s32.totalorder %s1934_s27, 1  ;;  %p2095_p2 = scmp.lt.s32.totalorder %s2552_s24, 2 }
  0x35   : > { %s2767_s18 = sand.u32 1, %s2548_s23   ;;  %p2769_p4 = por %p402_p13, %p52_p8 }
  0x36   : > { %p2773_p6 = por %p408_p0, %p58_p10  ;;  %s1943_s25 = sshll.u32 %s2767_s18, 4 }
  0x37   : > { %s3171_s4 = scalar_select %p2769_p4, 1, 0 }
  0x38   : > { %s3173_s6 = scalar_select %p2773_p6, 1, 0 }
  0x39   : > { %3172 = sst [smem:[#allocation28_spill]] %s3171_s4  ;;  %s2021_s26 = sshll.u32 %s2552_s24, 4 }
  0x3a   : > { %3174 = sst [smem:[#allocation29_spill]] %s3173_s6  ;;  %s540_s13 = scalar_lea.vmem [#allocation2], %s1943_s25 }
  0x3b   : > { %s3175_s15 = sld [smem:[#allocation30_spill]]  ;;  %s548_s8 = sshll.u32 %s540_s13, 4  ;;  %s549_s8 = int_to_ptr.vmem [resolvable:$true] %s548_s8 }
  0x3c   : > { %p2784_p7 = pnand %p2095_p2, %p2754_p11  ;;  %s558_s14 = sand.u32 1, %s2552_s24  }
  0x3d   : > { %s1946_s19 = sshll.u32 %s2767_s18, 5  ;;  %s537_s23 = scalar_lea.sflag [#allocation3], %s2767_s18 }
  0x3e   : > { %p2410_p9 = pneg %p2784_p7 }
  0x41   : > { %s545_s27 = scalar_lea.hbm %s3175_s15, %s2021_s26  ;;  %s2413_s25 = scalar_lea.hbm %s3175_s15, 32 }
  0x42   : > { %s546_s10 = sshll.u32 %s545_s27, 4  ;;  %s547_s10 = int_to_ptr.hbm [resolvable:$true] %s546_s10 }
  0x43   : > { %s2406_s0 = sshra.s32 %s547_s10, 4  ;;  %s2407_s0 = int_to_ptr.hbm [resolvable:$true] %s2406_s0 }
  0x44   : > { %s2408_s6 = scalar_lea.hbm %s2407_s0, 16  ;;  %p2414_p11 = scmp.lt.s32.totalorder %s2407_s0, %s3175_s15 }
  0x45   : > { %p2409_p8 = scmp.ne.s32.totalorder %s2407_s0, %s2408_s6  ;;  %p2415_p0 = scmp.lt.s32.totalorder %s2413_s25, %s2408_s6 }
  0x47   : > { %p2411_p10 = pnand %p2410_p9, %p2409_p8  ;;  %p2416_p2 = por %p2415_p0, %p2414_p11 }
  0x49   : > { %p2412_p13 = pneg %p2411_p10 }
  0x4b   : > { %p2417_p5 = pnand %p2416_p2, %p2412_p13 }
  0x4d   : > { %2420 = shalt.err (!%p2417_p5)
}
  0x4e   : > { %s3177_s18 = smov 8   ;;  %s3178_s17 = smov 128  }
  0x4f   : > { %2081 = dma.hbm_to_vmem [thread:$0]  (!%p2784_p7), %s547_s10, 256, %s549_s8, %s537_s23, %s3178_s17, %s3178_s17, %s3177_s18  }
  0x50   : > { %s2023_s27 = sshll.u32 %s2552_s24, 5  ;;  %s562_s4 = scalar_lea.vmem [#allocation5], %s1946_s19 }
  0x51   : > { %s568_s20 = scalar_lea.hbm %s3118_s1, %s2023_s27  ;;  %s571_s26 = sshll.u32 %s562_s4, 4  ;;  %s572_s26 = int_to_ptr.vmem [resolvable:$true] %s571_s26 }
  0x52   : > { %s569_s0 = sshll.u32 %s568_s20, 4  ;;  %s559_s6 = scalar_lea.sflag [#allocation6], %s558_s14  ;;  %s570_s0 = int_to_ptr.hbm [resolvable:$true] %s569_s0 }
  0x53   : > { %s2436_s25 = sshra.s32 %s570_s0, 4  ;;  %s2443_s23 = scalar_lea.hbm %s3118_s1, 64  ;;  %s2437_s25 = int_to_ptr.hbm [resolvable:$true] %s2436_s25 }
  0x54   : > { %s2438_s16 = scalar_lea.hbm %s2437_s25, 32  ;;  %p2444_p13 = scmp.lt.s32.totalorder %s2437_s25, %s3118_s1 }
  0x55   : > { %p2439_p5 = scmp.ne.s32.totalorder %s2437_s25, %s2438_s16  ;;  %p2445_p11 = scmp.lt.s32.totalorder %s2443_s23, %s2438_s16 }
  0x57   : > { %p2441_p8 = pnand %p2439_p5, %p2410_p9  ;;  %p2446_p0 = por %p2445_p11, %p2444_p13 }
  0x59   : > { %p2442_p10 = pneg %p2441_p8 }
  0x5b   : > { %p2447_p2 = pnand %p2446_p0, %p2442_p10 }
  0x5d   : > { %2450 = shalt.err (!%p2447_p2)
}
  0x5e   : > { %2084 = dma.hbm_to_vmem [thread:$0]  (!%p2784_p7), %s570_s0, 512, %s572_s26, %s559_s6, %s3178_s17, %s3178_s17, %s3177_s18  }
  0x5f   : > { %583 = sbr.rel (%p2681_p3) target bundleno = 2539 (0x9eb), region = 84  ;;  %s2828_s14 = sand.u32 (!%p2681_p3), 1, %s2544_s22  }
  0x60   : > { %s1951_s19 = sshll.u32 (!%p2681_p3), %s2828_s14, 4  ;;  %s586_s4 = scalar_lea.sflag (!%p2681_p3), [#allocation3], %s2828_s14 }
  0x61   : > { %s589_s13 = scalar_lea.vmem (!%p2681_p3), [#allocation2], %s1951_s19 }
  0x64   : > { %2511 = dma.done.wait (%p2760_p12), %s586_s4, 256  }
  0x65   : > { %2513 = vsyncadd (%p2760_p12), %s586_s4, 4294967040  ;;  %s595_s12 = sand.u32 1, %s2676_s28   ;;  %s1952_s29 = sshll.u32 %s2828_s14, 5 }
  0x66   : > { %s596_s18 = scalar_lea.sflag [#allocation6], %s595_s12  ;;  %s2840_s17 = scalar_lea.vmem [#allocation5], %s1952_s29 }
  0x67   : > { %2515 = dma.done.wait (%p2760_p12), %s596_s18, 512  }
  0x68   : > { %2517 = vsyncadd (%p2760_p12), %s596_s18, 4294966784 }
  0x69   : > { %2519 = dma.done.wait (%p59_p1), [#allocation6], 512  }
  0x6a   : > { %2521 = vsyncadd (%p59_p1), [#allocation6], 4294966784 }
  0x6b   : > { %2523 = dma.done.wait (%p59_p1), [#allocation9], 512  }
  0x6c   : > { %2525 = vsyncadd (%p59_p1), [#allocation9], 4294966784 }
  0x6d   : > { %2527 = dma.done.wait (%p59_p1), [#allocation12], 1024  }
  0x6e   : > { %2529 = vsyncadd (%p59_p1), [#allocation12], 4294966272 }
  0x6f   : > { %2531 = dma.done.wait (%p59_p1), [#allocation15], 512  }
  0x70   : > { %2533 = vsyncadd (%p59_p1), [#allocation15], 4294966784  ;;  %vm693_vm0 = vcmask 261120   ;;  %v2862_v0 = vld [vmem:[%s589_s13] sm:$0xff]  ;;  %v2864_v1 = vld [vmem:[%s589_s13 + $0x8] sm:$0xff]  ;;  %vm797_vm1 = vcmask 130048  }
  0x71   : > { %v694_v2 = vsel %vm693_vm0, %v2862_v0, 0.0  ;;  %v697_v3 = vsel %vm693_vm0, %v2864_v1, 0.0  ;;  %v700_v4 = vmul.f32 %v2862_v0, %v2862_v0  ;;  %v701_v5 = vmul.f32 %v2864_v1, %v2864_v1  ;;  %v792_v8 = vld [vmem:[#allocation8 + $0x8] sm:$0xff]  ;;  %v791_v9 = vld [vmem:[#allocation8] sm:$0xff]  ;;  %v757_v12 = vld [vmem:[#allocation7 + $0x18] sm:$0xff]  ;;  %s2562_s16 = smov 120  }
  0x72   : > { %695 = vadd.xlane.f32.xlu0 %v694_v2  ;;  %698 = vadd.xlane.f32.xlu1 %v697_v3  ;;  %v689_v10 = vld [vmem:[%s2840_s17] sm:$0xff]  ;;  %v690_v11 = vld [vmem:[%s2840_s17 + $0x8] sm:$0xff]  ;;  %v691_v13 = vld [vmem:[%s2840_s17 + $0x10] sm:$0xff]  ;;  %vm874_vm8 = vcmask 64512   ;;  %s2563_s27 = smov 112   ;;  %s2564_s4 = smov 104  }
  0x73   : > { %v702_v6 = vsel %vm693_vm0, %v700_v4, 0.0  ;;  %v705_v7 = vsel %vm693_vm0, %v701_v5, 0.0  ;;  %824 = vmatpush.msra.mxu1 %v792_v8  ;;  %v756_v14 = vld [vmem:[#allocation7 + $0x10] sm:$0xff]  ;;  %780 = vmatpush.msra.mxu0 %v757_v12  ;;  %v755_v17 = vld [vmem:[#allocation7 + $0x8] sm:$0xff]  ;;  %v754_v19 = vld [vmem:[#allocation7] sm:$0xff]  ;;  %s3180_s26 = sld [smem:[#allocation38_spill]] }
  0x74   : > { %2025 = vmatpush.msra.mxu3 %v757_v12  ;;  %v692_v22 = vld [vmem:[%s2840_s17 + $0x18] sm:$0xff]  ;;  %v839_v26 = vld [vmem:[#allocation10] sm:$0xff]  ;;  %v2178_v48 = vld [vmem:[%s3119_s2] ss:$0 sm:$0xff]  ;;  %s3179_s17 = sld [smem:[#allocation36_spill]]  ;;  %s683_s0 = scalar_lea.vmem [#allocation16], %s1951_s19 }
  0x75   : > { %825 = vmatpush.msra.mxu1 %v791_v9  ;;  %781 = vmatpush.msra.mxu0 %v756_v14  ;;  %v840_v25 = vld [vmem:[#allocation10 + $0x8] sm:$0xff]  ;;  %v2179_v51 = vld [vmem:[%s3120_s3] ss:$0 sm:$0xff]  ;;  %s2024_s25 = sshll.u32 %s2676_s28, 4  ;;  %s3182_s10 = sld [smem:[#allocation39_spill]] }
  0x76   : > { %1962 = vmatmul.msk.f32.vlgmr.msra.gmra.mxu1 %vm797_vm1, %v689_v10  ;;  %2026 = vmatpush.msra.mxu3 %v756_v14  ;;  %v2180_v58 = vld [vmem:[%s3124_s7] ss:$0 sm:$0xff]  ;;  %s1778_s21 = sshll.u32 %s683_s0, 4  ;;  %s1779_s21 = int_to_ptr.vmem [resolvable:$true] %s1778_s21 }
  0x77   : > { %782 = vmatpush.msra.mxu0 %v755_v17  ;;  %859 = vmatpush.msra.mxu2 %v840_v25  ;;  %v2182_v4 = vld [vmem:[%s3126_s9] ss:$0 sm:$0xff] }
  0x78   : > { %2027 = vmatpush.msra.mxu3 %v755_v17  ;;  %v2181_v8 = vld [vmem:[%s3122_s5] ss:$0 sm:$0xff] }
  0x79   : > { %783 = vmatpush.msra.mxu0 %v754_v19  ;;  %860 = vmatpush.msra.mxu2 %v839_v26 }
  0x7a   : > { %703 = vadd.xlane.f32.xlu0 %v702_v6  ;;  %706 = vadd.xlane.f32.xlu1 %v705_v7 }
  0x7b   : > { %2028 = vmatpush.msra.mxu3 %v754_v19  ;;  %1966 = vmatmul.msk.f32.vlgmr.msra.gmra.mxu2 %vm797_vm1, %v689_v10  ;;  %s1777_s23 = scalar_lea.hbm %s3182_s10, %s2024_s25  ;;  %s2486_s29 = scalar_lea.hbm %s3182_s10, 32 }
  0x7e   : > { %1963 = vmatmul.msk.f32.gmra.mxu1 %vm797_vm1, %v690_v11 }
  0x83   : > { %1967 = vmatmul.msk.f32.gmra.mxu2 %vm797_vm1, %v690_v11 }
  0x86   : > { %1964 = vmatmul.msk.f32.gmra.mxu1 %vm797_vm1, %v691_v13 }
  0x8b   : > { %1968 = vmatmul.msk.f32.gmra.mxu2 %vm797_vm1, %v691_v13 }
  0x8e   : > { %1965 = vmatmul.msk.f32.gmra.mxu1 %vm797_vm1, %v692_v22 }
  0x93   : > { %1969 = vmatmul.msk.f32.gmra.mxu2 %vm797_vm1, %v692_v22 }
  0xe5   : > { %v696_v15 = vpop.xlane.xlu0 %695  ;;  %v699_v16 = vpop.xlane.xlu1 %698 }
  0xe6   : > { %v709_v18 = vmul.f32 0.03125, %v699_v16  ;;  %v708_v20 = vmul.f32 0.03125, %v696_v15 }
  0xe8   : > { %v713_v21 = vmul.f32 %v709_v18, %v709_v18  ;;  %v712_v27 = vmul.f32 %v708_v20, %v708_v20  ;;  %v717_v44 = vsub.f32 %v2864_v1, %v709_v18  ;;  %v716_v46 = vsub.f32 %v2862_v0, %v708_v20 }
  0xed   : > { %v704_v23 = vpop.xlane.xlu0 %703  ;;  %v707_v24 = vpop.xlane.xlu1 %706 }
  0xee   : > { %v710_v28 = vmul.f32 0.03125, %v704_v23  ;;  %v711_v29 = vmul.f32 0.03125, %v707_v24 }
  0xf0   : > { %v714_v30 = vsub.f32 %v710_v28, %v712_v27  ;;  %v715_v31 = vsub.f32 %v711_v29, %v713_v21 }
  0xf2   : > { %v718_v32 = vadd.f32 1e-05, %v714_v30  ;;  %v719_v33 = vadd.f32 1e-05, %v715_v31 }
  0xf3   : > { %v827_v59 = vpop.f32.mrf.mxu1 }
  0xf4   : > { %2186 = vrsqrt.f32 %v718_v32  ;;  %vm736_vm2 = vweird.f32 %v719_v33  ;;  %vm726_vm5 = vweird.f32 %v718_v32  ;;  %v2907_v60 = vadd.f32 %v2180_v58, %v827_v59 }
  0xf5   : > { %2188 = vrsqrt.f32 %v719_v33 }
  0xf6   : > { %1030 = vrot.lane.b32.xlu1 %v2907_v60, %s2562_s16 }
  0xfa   : > { %v2187_v34 = vpop.eup %2186 }
  0xfb   : > { %v2189_v35 = vpop.eup %2188  ;;  %v721_v36 = vmul.f32 %v2187_v34, %v718_v32  ;;  %vm727_vm4 = vweird.f32 %v2187_v34  ;;  %v830_v61 = vpop.f32.mrf.mxu1 }
  0xfc   : > { %v731_v37 = vmul.f32 %v2189_v35, %v719_v33  ;;  %vm737_vm3 = vweird.f32 %v2189_v35  ;;  %vm728_vm7 = vmor %vm726_vm5, %vm727_vm4  ;;  %v2911_v62 = vadd.f32 %v2180_v58, %v830_v61 }
  0xfd   : > { %v722_v38 = vmul.f32 %v2187_v34, %v721_v36  ;;  %vm738_vm6 = vmor %vm736_vm2, %vm737_vm3 }
  0xfe   : > { %v732_v39 = vmul.f32 %v2189_v35, %v731_v37  ;;  %1970 = vmatpush.xpose.msk.msrb.mxu3 %vm874_vm8, %v2911_v62  ;;  %1032 = vrot.lane.b32.xlu0 %v2911_v62, %s2562_s16  ;;  %v862_v3 = vpop.f32.mrf.mxu2 }
  0xff   : > { %v723_v40 = vmul.f32 0.5, %v722_v38  ;;  %v2930_v6 = vadd.f32 %v2182_v4, %v862_v3 }
 0x100   : > { %v733_v41 = vmul.f32 0.5, %v732_v39 }
 0x101   : > { %v724_v42 = vsub.f32 1.5, %v723_v40 }
 0x102   : > { %v734_v43 = vsub.f32 1.5, %v733_v41  ;;  %1971 = vmatpush.xpose.msk.msrb.mxu3 %vm874_vm8, %v2907_v60 }
 0x103   : > { %v725_v45 = vmul.f32 %v2187_v34, %v724_v42  ;;  %v833_v63 = vpop.f32.mrf.mxu1 }
 0x104   : > { %v735_v47 = vmul.f32 %v2189_v35, %v734_v43  ;;  %v2921_v2 = vadd.f32 %v2180_v58, %v833_v63 }
 0x105   : > { %v729_v49 = vsel %vm728_vm7, %v2187_v34, %v725_v45 }
 0x106   : > { %v740_v50 = vmul.f32 %v729_v49, %v716_v46  ;;  %v739_v52 = vsel %vm738_vm6, %v2189_v35, %v735_v47  ;;  %v865_v5 = vpop.f32.mrf.mxu2 }
 0x107   : > { %v741_v53 = vmul.f32 %v739_v52, %v717_v44  ;;  %v2932_v7 = vadd.f32 %v2182_v4, %v865_v5 }
 0x108   : > { %v746_v54 = vmul.f32 %v2178_v48, %v740_v50 }
 0x109   : > { %v747_v55 = vmul.f32 %v2178_v48, %v741_v53  ;;  %998 = vmatpush.msrb.mxu0 %v2932_v7 }
 0x10a   : > { %v2896_v56 = vadd.f32 %v2179_v51, %v746_v54 }
 0x10b   : > { %v2898_v57 = vadd.f32 %v2179_v51, %v747_v55  ;;  %v836_v0 = vpop.f32.mrf.mxu1  ;;  %999 = vmatpush.msrb.mxu0 %v2930_v6 }
 0x10c   : > { %1960 = vmatmul.msk.f32.vlgmr.msra.gmra.mxu0 %vm693_vm0, %v2896_v56  ;;  %v2919_v1 = vadd.f32 %v2180_v58, %v836_v0 }
 0x10d   : > { %1961 = vmatmul.msk.f32.vlgmr.msra.gmra.mxu3 %vm693_vm0, %v2898_v57 }
 0x10e   : > { %1973 = vmatpush.xpose.msk.msra.mxu3 %vm874_vm8, %v2919_v1  ;;  %v868_v29 = vpop.f32.mrf.mxu2 }
 0x10f   : > { %v2965_v32 = vadd.f32 %v2182_v4, %v868_v29 }
 0x112   : > { %1974 = vmatpush.xpose.msk.msra.mxu3 %vm874_vm8, %v2921_v2 }
 0x116   : > { %v871_v30 = vpop.f32.mrf.mxu2 }
 0x117   : > { %v2963_v31 = vadd.f32 %v2182_v4, %v871_v30  ;;  %v2978_v4 = vpack.i.bf16 %v2930_v6, %v2932_v7 }
 0x168   : > { %v1031_v14 = vpop.permute.xlu1 %1030 }
 0x170   : > { %v1033_v13 = vpop.permute.xlu0 %1032 }
 0x171   : > { %1978 = vmatpush.xpose.msk.msra.mxu0 %vm874_vm8, %v1033_v13 }
 0x175   : > { %1979 = vmatpush.xpose.msk.msra.mxu0 %vm874_vm8, %v1031_v14 }
 0x189   : > { %v785_v9 = vpop.f32.mrf.mxu0 }
 0x18a   : > { %v2939_v10 = vadd.f32 %v2181_v8, %v785_v9 }
 0x18c   : > { %1972 = vmatmul.msk.f32.vlgmr.msrb.gmra.mxu3 %vm874_vm8, %v2939_v10 }
 0x18d   : > { %1021 = vmatpush.msrb.mxu3 %v2963_v31 }
 0x18f   : > { %1022 = vmatpush.msrb.mxu3 %v2965_v32 }
 0x190   : > { %v788_v11 = vpop.f32.mrf.mxu3 }
 0x191   : > { %v2943_v12 = vadd.f32 %v2181_v8, %v788_v11  ;;  %v1027_v11 = vld [vmem:[#allocation11] sm:$0xff] }
 0x194   : > { %1975 = vmatmul.msk.f32.vlgmr.msra.gmra.mxu3 %vm874_vm8, %v2943_v12 }
 0x20f   : > { %v901_v15 = vpop.f32.mrf.mxu3 }
 0x210   : > { %v933_v16 = vsel %vm797_vm1, %v901_v15, -inf }
 0x211   : > { %934 = vmax.xlane.f32.xlu2 %v933_v16 }
 0x217   : > { %v930_v17 = vpop.f32.mrf.mxu3 }
 0x218   : > { %v936_v18 = vsel %vm797_vm1, %v930_v17, -inf }
 0x219   : > { %937 = vmax.xlane.f32.xlu0 %v936_v18 }
 0x22d   : > { %1064 = vrot.lane.b32.xlu0 %v2919_v1, %s2562_s16 }
 0x284   : > { %v935_v19 = vpop.xlane.xlu2 %934 }
 0x285   : > { %v939_v20 = vsub.f32 %v901_v15, %v935_v19 }
 0x287   : > { %v941_v21 = vmul.f32 1.442695, %v939_v20 }
 0x289   : > { %2190 = vpow2.f32 %v941_v21  ;;  %v2993_v21 = vpack.i.bf16 %v2965_v32, %v2963_v31 }
 0x28c   : > { %v938_v22 = vpop.xlane.xlu0 %937 }
 0x28d   : > { %v940_v23 = vsub.f32 %v930_v17, %v938_v22 }
 0x28f   : > { %v2191_v24 = vpop.eup %2190  ;;  %v943_v25 = vmul.f32 1.442695, %v940_v23 }
 0x290   : > { %v945_v26 = vsel %vm797_vm1, %v2191_v24, 0.0 }
 0x291   : > { %2192 = vpow2.f32 %v943_v25  ;;  %946 = vadd.xlane.f32.xlu2 %v945_v26 }
 0x297   : > { %v2193_v27 = vpop.eup %2192 }
 0x298   : > { %v948_v28 = vsel %vm797_vm1, %v2193_v27, 0.0 }
 0x299   : > { %949 = vadd.xlane.f32.xlu1 %v948_v28 }
 0x29f   : > { %v1065_v46 = vpop.permute.xlu0 %1064 }
 0x2a0   : > { %1981 = vmatpush.xpose.msk.msra.mxu3 %vm874_vm8, %v1065_v46 }
 0x2a9   : > { %1028 = vrot.lane.b32.xlu2 %v2939_v10, %s2562_s16 }
 0x2b2   : > { %1060 = vrot.lane.b32.xlu1 %v2943_v12, %s2562_s16 }
 0x2ba   : > { %1265 = vrot.lane.b32.xlu1 %v2911_v62, %s2563_s27 }
 0x2c2   : > { %1261 = vrot.lane.b32.xlu1 %v2939_v10, %s2563_s27 }
 0x304   : > { %v947_v33 = vpop.xlane.xlu2 %946 }
 0x305   : > { %2194 = vrcp.f32 %v947_v33  ;;  %v962_v38 = vand.u32 2147483648, %v947_v33  ;;  %v960_v40 = vand.u32 2147483647, %v947_v33  ;;  %vm956_vm10 = vweird.f32 %v947_v33 }
 0x307   : > { %v963_v43 = vor.u32 1.1754944e-38, %v962_v38  ;;  %vm961_vm12 = vcmp.eq.f32.partialorder %v960_v40, 8.507059e+37  ;;  %v1202_v40 = vld [vmem:[#allocation11 + $0x8] sm:$0xff] }
 0x30b   : > { %v2195_v34 = vpop.eup %2194 }
 0x30c   : > { %v952_v35 = vmul.f32 %v2195_v34, %v947_v33  ;;  %v950_v36 = vpop.xlane.xlu1 %949  ;;  %vm957_vm9 = vweird.f32 %v2195_v34  ;;  %v1029_v61 = vpop.permute.xlu2 %1028 }
 0x30d   : > { %2196 = vrcp.f32 %v950_v36  ;;  %vm958_vm11 = vmor %vm956_vm10, %vm957_vm9  ;;  %v977_v50 = vand.u32 2147483648, %v950_v36  ;;  %v975_v52 = vand.u32 2147483647, %v950_v36  ;;  %vm971_vm14 = vweird.f32 %v950_v36 }
 0x30e   : > { %v953_v37 = vsub.f32 1.0, %v952_v35 }
 0x30f   : > { %v978_v54 = vor.u32 1.1754944e-38, %v977_v50  ;;  %vm976_vm2 = vcmp.eq.f32.partialorder %v975_v52, 8.507059e+37 }
 0x310   : > { %v954_v39 = vmul.f32 %v2195_v34, %v953_v37 }
 0x312   : > { %v955_v41 = vadd.f32 %v2195_v34, %v954_v39 }
 0x313   : > { %v2197_v42 = vpop.eup %2196 }
 0x314   : > { %v967_v44 = vmul.f32 %v2197_v42, %v950_v36  ;;  %v959_v45 = vsel %vm958_vm11, %v2195_v34, %v955_v41  ;;  %vm972_vm13 = vweird.f32 %v2197_v42 }
 0x315   : > { %v964_v47 = vsel %vm961_vm12, %v963_v43, %v959_v45  ;;  %vm973_vm15 = vmor %vm971_vm14, %vm972_vm13 }
 0x316   : > { %v968_v48 = vsub.f32 1.0, %v967_v44  ;;  %v965_v49 = vmul.f32 %v2191_v24, %v964_v47 }
 0x318   : > { %v969_v51 = vmul.f32 %v2197_v42, %v968_v48  ;;  %1976 = vmatmul.msk.f32.vlgmr.msrb.gmra.mxu0 %vm797_vm1, %v965_v49 }
 0x319   : > { %1224 = vmatpush.msrb.mxu0 %v1202_v40 }
 0x31a   : > { %v970_v53 = vadd.f32 %v2197_v42, %v969_v51 }
 0x31c   : > { %v974_v55 = vsel %vm973_vm15, %v2197_v42, %v970_v53 }
 0x31d   : > { %v979_v58 = vsel %vm976_vm2, %v978_v54, %v974_v55 }
 0x31e   : > { %v980_v59 = vmul.f32 %v2193_v27, %v979_v58 }
 0x320   : > { %1977 = vmatmul.msk.f32.vlgmr.msrb.gmra.mxu3 %vm797_vm1, %v980_v59  ;;  %1980 = vmatmul.msk.f32.vlgmr.msra.gmra.mxu0 %vm874_vm8, %v1029_v61 }
 0x324   : > { %v1061_v15 = vpop.permute.xlu1 %1060 }
 0x32c   : > { %v1266_v18 = vpop.permute.xlu1 %1265 }
 0x334   : > { %v1262_v39 = vpop.permute.xlu1 %1261 }
 0x395   : > { %v1001_v63 = vpop.f32.mrf.mxu0 }
 0x39d   : > { %v1057_v0 = vpop.f32.mrf.mxu0 }
 0x39e   : > { %v1092_v3 = vsel %vm797_vm1, %v1057_v0, -inf }
 0x39f   : > { %1093 = vmax.xlane.f32.xlu2 %v1092_v3 }
 0x3a3   : > { %v1024_v20 = vpop.f32.mrf.mxu3 }
 0x3b7   : > { %1062 = vrot.lane.b32.xlu2 %v2921_v2, %s2562_s16 }
 0x3bf   : > { %2149 = vrot.lane.b32.xlu2 %v2978_v4, %s2562_s16 }
 0x3c7   : > { %1263 = vrot.lane.b32.xlu2 %v2907_v60, %s2563_s27 }
 0x412   : > { %v1094_v5 = vpop.xlane.xlu2 %1093 }
 0x413   : > { %v1098_v8 = vsub.f32 %v1057_v0, %v1094_v5 }
 0x415   : > { %v1100_v9 = vmul.f32 1.442695, %v1098_v8 }
 0x417   : > { %2198 = vpow2.f32 %v1100_v9 }
 0x41a   : > { %v1063_v13 = vpop.permute.xlu2 %1062 }
 0x41b   : > { %1982 = vmatpush.xpose.msk.msra.mxu3 %vm874_vm8, %v1063_v13 }
 0x41d   : > { %v2199_v14 = vpop.eup %2198 }
 0x41e   : > { %1983 = vmatmul.msk.f32.vlgmr.msra.gmra.mxu3 %vm874_vm8, %v1061_v15  ;;  %v1104_v6 = vsel %vm797_vm1, %v2199_v14, 0.0 }
 0x41f   : > { %1253 = vmatpush.msrb.mxu3 %v1027_v11  ;;  %1105 = vadd.xlane.f32.xlu0 %v1104_v6 }
 0x422   : > { %v2150_v7 = vpop.permute.xlu2 %2149 }
 0x423   : > { %v2151_v16 = vunpack.i.l.bf16 %v2150_v7  ;;  %v2152_v17 = vunpack.i.h.bf16 %v2150_v7 }
 0x425   : > { %1165 = vmatpush.msrb.mxu1 %v2151_v16 }
 0x426   : > { %1988 = vmatmul.msk.f32.vlgmr.msrb.gmra.mxu3 %vm874_vm8, %v1001_v63 }
 0x427   : > { %1166 = vmatpush.msrb.mxu1 %v2152_v17 }
 0x429   : > { %1990 = vmatpush.xpose.msk.msra.mxu1 %vm874_vm8, %v1266_v18 }
 0x42a   : > { %v1264_v19 = vpop.permute.xlu2 %1263 }
 0x42d   : > { %1991 = vmatpush.xpose.msk.msra.mxu1 %vm874_vm8, %v1264_v19 }
 0x42e   : > { %1989 = vmatmul.msk.f32.gmra.mxu3 %vm874_vm8, %v1024_v20 }
 0x433   : > { %2154 = vrot.lane.b32.xlu0 %v2993_v21, %s2562_s16 }
 0x43b   : > { %1295 = vrot.lane.b32.xlu0 %v2921_v2, %s2563_s27 }
 0x492   : > { %v1106_v22 = vpop.xlane.xlu0 %1105 }
 0x493   : > { %2200 = vrcp.f32 %v1106_v22  ;;  %v1121_v26 = vand.u32 2147483648, %v1106_v22  ;;  %v1119_v28 = vand.u32 2147483647, %v1106_v22  ;;  %vm1115_vm4 = vweird.f32 %v1106_v22 }
 0x495   : > { %v1122_v30 = vor.u32 1.1754944e-38, %v1121_v26  ;;  %vm1120_vm6 = vcmp.eq.f32.partialorder %v1119_v28, 8.507059e+37 }
 0x499   : > { %v2201_v23 = vpop.eup %2200 }
 0x49a   : > { %v1111_v24 = vmul.f32 %v2201_v23, %v1106_v22  ;;  %vm1116_vm3 = vweird.f32 %v2201_v23 }
 0x49b   : > { %vm1117_vm5 = vmor %vm1115_vm4, %vm1116_vm3 }
 0x49c   : > { %v1112_v25 = vsub.f32 1.0, %v1111_v24 }
 0x49e   : > { %v1113_v27 = vmul.f32 %v2201_v23, %v1112_v25 }
 0x4a0   : > { %v1114_v29 = vadd.f32 %v2201_v23, %v1113_v27 }
 0x4a1   : > { %v1089_v31 = vpop.f32.mrf.mxu3 }
 0x4a2   : > { %v1095_v32 = vsel %vm797_vm1, %v1089_v31, -inf  ;;  %v1118_v33 = vsel %vm1117_vm5, %v2201_v23, %v1114_v29 }
 0x4a3   : > { %1096 = vmax.xlane.f32.xlu2 %v1095_v32  ;;  %v1123_v34 = vsel %vm1120_vm6, %v1122_v30, %v1118_v33 }
 0x4a4   : > { %v1124_v35 = vmul.f32 %v2199_v14, %v1123_v34 }
 0x4a5   : > { %v2155_v36 = vpop.permute.xlu0 %2154 }
 0x4a6   : > { %1984 = vmatmul.msk.f32.vlgmr.msrb.gmra.mxu1 %vm797_vm1, %v1124_v35  ;;  %v2156_v37 = vunpack.i.l.bf16 %v2155_v36  ;;  %v2157_v38 = vunpack.i.h.bf16 %v2155_v36 }
 0x4a8   : > { %1196 = vmatpush.msrb.mxu2 %v2156_v37  ;;  %v1431_v37 = vld [vmem:[#allocation11 + $0x10] sm:$0xff] }
 0x4a9   : > { %v3032_v17 = vpop.f32.mrf.mxu3  ;;  %1453 = vmatpush.msra.mxu0 %v1431_v37 }
 0x4aa   : > { %1197 = vmatpush.msrb.mxu2 %v2157_v38 }
 0x4ad   : > { %v1296_v46 = vpop.permute.xlu0 %1295 }
 0x4ae   : > { %1992 = vmatmul.msk.f32.vlgmr.msra.gmra.mxu1 %vm874_vm8, %v1262_v39 }
 0x4b1   : > { %v3035_v28 = vpop.f32.mrf.mxu3 }
 0x4bb   : > { %1297 = vrot.lane.b32.xlu2 %v2919_v1, %s2563_s27 }
 0x4c3   : > { %1463 = vrot.lane.b32.xlu2 %v2939_v10, %s2564_s4 }
 0x4cb   : > { %1499 = vrot.lane.b32.xlu2 %v2919_v1, %s2564_s4 }
 0x516   : > { %v1097_v41 = vpop.xlane.xlu2 %1096 }
 0x517   : > { %v1099_v42 = vsub.f32 %v1089_v31, %v1097_v41 }
 0x519   : > { %v1102_v43 = vmul.f32 1.442695, %v1099_v42 }
 0x51b   : > { %2202 = vpow2.f32 %v1102_v43 }
 0x51e   : > { %v1298_v44 = vpop.permute.xlu2 %1297 }
 0x51f   : > { %1993 = vmatpush.xpose.msk.msra.mxu2 %vm874_vm8, %v1298_v44 }
 0x521   : > { %v2203_v45 = vpop.eup %2202 }
 0x522   : > { %v1107_v47 = vsel %vm797_vm1, %v2203_v45, 0.0 }
 0x523   : > { %1108 = vadd.xlane.f32.xlu0 %v1107_v47  ;;  %v1168_v48 = vpop.f32.mrf.mxu1  ;;  %1994 = vmatpush.xpose.msk.msra.mxu2 %vm874_vm8, %v1296_v46 }
 0x524   : > { %1986 = vmatmul.msk.f32.vlgmr.msrb.gmra.mxu0 %vm874_vm8, %v1168_v48 }
 0x526   : > { %v1464_v11 = vpop.permute.xlu2 %1463 }
 0x52b   : > { %v1290_v1 = vpop.f32.mrf.mxu1 }
 0x52c   : > { %v1325_v10 = vsel %vm797_vm1, %v1290_v1, -inf }
 0x52d   : > { %1326 = vmax.xlane.f32.xlu1 %v1325_v10 }
 0x52e   : > { %v1500_v7 = vpop.permute.xlu2 %1499 }
 0x537   : > { %1467 = vrot.lane.b32.xlu0 %v2911_v62, %s2564_s4 }
 0x53f   : > { %1465 = vrot.lane.b32.xlu0 %v2907_v60, %s2564_s4 }
 0x546   : > { %1293 = vrot.lane.b32.xlu1 %v2943_v12, %s2563_s27 }
 0x547   : > { %2159 = vrot.lane.b32.xlu0 %v2978_v4, %s2563_s27 }
 0x54f   : > { %1495 = vrot.lane.b32.xlu0 %v2943_v12, %s2564_s4 }
 0x596   : > { %v1109_v49 = vpop.xlane.xlu0 %1108 }
 0x597   : > { %2204 = vrcp.f32 %v1109_v49  ;;  %v1136_v54 = vand.u32 2147483648, %v1109_v49  ;;  %v1134_v60 = vand.u32 2147483647, %v1109_v49  ;;  %vm1130_vm9 = vweird.f32 %v1109_v49 }
 0x599   : > { %v1137_v61 = vor.u32 1.1754944e-38, %v1136_v54  ;;  %vm1135_vm11 = vcmp.eq.f32.partialorder %v1134_v60, 8.507059e+37 }
 0x59d   : > { %v2205_v50 = vpop.eup %2204 }
 0x59e   : > { %v1126_v51 = vmul.f32 %v2205_v50, %v1109_v49  ;;  %vm1131_vm7 = vweird.f32 %v2205_v50 }
 0x59f   : > { %vm1132_vm10 = vmor %vm1130_vm9, %vm1131_vm7 }
 0x5a0   : > { %v1127_v52 = vsub.f32 1.0, %v1126_v51  ;;  %v1327_v53 = vpop.xlane.xlu1 %1326 }
 0x5a1   : > { %v1331_v62 = vsub.f32 %v1290_v1, %v1327_v53 }
 0x5a2   : > { %v1128_v55 = vmul.f32 %v2205_v50, %v1127_v52 }
 0x5a3   : > { %v1333_v58 = vmul.f32 1.442695, %v1331_v62 }
 0x5a4   : > { %v1129_v59 = vadd.f32 %v2205_v50, %v1128_v55 }
 0x5a5   : > { %2206 = vpow2.f32 %v1333_v58 }
 0x5a6   : > { %v1133_v63 = vsel %vm1132_vm10, %v2205_v50, %v1129_v59 }
 0x5a7   : > { %v1138_v12 = vsel %vm1135_vm11, %v1137_v61, %v1133_v63 }
 0x5a8   : > { %v1139_v0 = vmul.f32 %v2203_v45, %v1138_v12 }
 0x5a9   : > { %v1468_v3 = vpop.permute.xlu0 %1467 }
 0x5aa   : > { %1985 = vmatmul.msk.f32.vlgmr.msrb.gmra.mxu2 %vm797_vm1, %v1139_v0  ;;  %2000 = vmatpush.xpose.msk.msra.mxu3 %vm874_vm8, %v1468_v3 }
 0x5ab   : > { %v2207_v5 = vpop.eup %2206 }
 0x5ac   : > { %v1337_v8 = vsel %vm797_vm1, %v2207_v5, 0.0 }
 0x5ad   : > { %1338 = vadd.xlane.f32.xlu1 %v1337_v8 }
 0x5b1   : > { %v1466_v9 = vpop.permute.xlu0 %1465 }
 0x5b2   : > { %2001 = vmatpush.xpose.msk.msra.mxu3 %vm874_vm8, %v1466_v9 }
 0x5b5   : > { %2002 = vmatmul.msk.f32.vlgmr.msra.gmra.mxu3 %vm874_vm8, %v1464_v11 }
 0x5b8   : > { %v1294_v13 = vpop.permute.xlu1 %1293 }
 0x5b9   : > { %v2160_v14 = vpop.permute.xlu0 %2159  ;;  %1995 = vmatmul.msk.f32.vlgmr.msra.gmra.mxu2 %vm874_vm8, %v1294_v13 }
 0x5ba   : > { %v2161_v15 = vunpack.i.l.bf16 %v2160_v14  ;;  %v2162_v6 = vunpack.i.h.bf16 %v2160_v14 }
 0x5bc   : > { %1396 = vmatpush.msrb.mxu1 %v2161_v15 }
 0x5be   : > { %1397 = vmatpush.msrb.mxu1 %v2162_v6 }
 0x5c0   : > { %2003 = vmatpush.xpose.msk.msra.mxu1 %vm874_vm8, %v1500_v7 }
 0x5c1   : > { %v1496_v34 = vpop.permute.xlu0 %1495 }
 0x5c6   : > { %1497 = vrot.lane.b32.xlu1 %v2921_v2, %s2564_s4 }
 0x620   : > { %v1339_v16 = vpop.xlane.xlu1 %1338 }
 0x621   : > { %2208 = vrcp.f32 %v1339_v16  ;;  %v1354_v22 = vand.u32 2147483648, %v1339_v16  ;;  %v1352_v24 = vand.u32 2147483647, %v1339_v16  ;;  %vm1348_vm13 = vweird.f32 %v1339_v16 }
 0x623   : > { %v1355_v27 = vor.u32 1.1754944e-38, %v1354_v22  ;;  %vm1353_vm15 = vcmp.eq.f32.partialorder %v1352_v24, 8.507059e+37 }
 0x627   : > { %v2209_v18 = vpop.eup %2208 }
 0x628   : > { %v1344_v19 = vmul.f32 %v2209_v18, %v1339_v16  ;;  %vm1349_vm12 = vweird.f32 %v2209_v18 }
 0x629   : > { %vm1350_vm14 = vmor %vm1348_vm13, %vm1349_vm12 }
 0x62a   : > { %v1345_v20 = vsub.f32 1.0, %v1344_v19 }
 0x62c   : > { %v1346_v23 = vmul.f32 %v2209_v18, %v1345_v20 }
 0x62d   : > { %v1199_v25 = vpop.f32.mrf.mxu2 }
 0x62e   : > { %v1347_v26 = vadd.f32 %v2209_v18, %v1346_v23  ;;  %1987 = vmatmul.msk.f32.gmra.mxu0 %vm874_vm8, %v1199_v25 }
 0x630   : > { %v1351_v2 = vsel %vm1350_vm14, %v2209_v18, %v1347_v26 }
 0x631   : > { %v1356_v29 = vsel %vm1353_vm15, %v1355_v27, %v1351_v2  ;;  %v1633_v2 = vld [vmem:[#allocation11 + $0x18] sm:$0xff] }
 0x632   : > { %v1357_v30 = vmul.f32 %v2207_v5, %v1356_v29 }
 0x634   : > { %1996 = vmatmul.msk.f32.vlgmr.msrb.gmra.mxu1 %vm797_vm1, %v1357_v30 }
 0x638   : > { %v1498_v31 = vpop.permute.xlu1 %1497  ;;  %v1492_v32 = vpop.f32.mrf.mxu3 }
 0x639   : > { %2004 = vmatpush.xpose.msk.msra.mxu1 %vm874_vm8, %v1498_v31  ;;  %v1527_v33 = vsel %vm797_vm1, %v1492_v32, -inf }
 0x63a   : > { %1528 = vmax.xlane.f32.xlu1 %v1527_v33 }
 0x63c   : > { %v1322_v35 = vpop.f32.mrf.mxu2  ;;  %2005 = vmatmul.msk.f32.vlgmr.msra.gmra.mxu1 %vm874_vm8, %v1496_v34 }
 0x63d   : > { %v1328_v36 = vsel %vm797_vm1, %v1322_v35, -inf  ;;  %1655 = vmatpush.msrb.mxu1 %v1633_v2 }
 0x63e   : > { %1329 = vmax.xlane.f32.xlu2 %v1328_v36 }
 0x6ad   : > { %v1529_v38 = vpop.xlane.xlu1 %1528 }
 0x6ae   : > { %v1533_v39 = vsub.f32 %v1492_v32, %v1529_v38 }
 0x6b0   : > { %v1535_v40 = vmul.f32 1.442695, %v1533_v39 }
 0x6b1   : > { %v1399_v41 = vpop.f32.mrf.mxu1  ;;  %v1330_v42 = vpop.xlane.xlu2 %1329 }
 0x6b2   : > { %2210 = vpow2.f32 %v1535_v40  ;;  %v1332_v43 = vsub.f32 %v1322_v35, %v1330_v42  ;;  %1998 = vmatmul.msk.f32.vlgmr.msra.gmra.mxu0 %vm874_vm8, %v1399_v41 }
 0x6b4   : > { %v1335_v44 = vmul.f32 1.442695, %v1332_v43 }
 0x6b6   : > { %2212 = vpow2.f32 %v1335_v44  ;;  %v1676_v44 = vld [vmem:[#allocation13 + $0x18] sm:$0xff] }
 0x6b8   : > { %v2211_v45 = vpop.eup %2210 }
 0x6b9   : > { %v1524_v46 = vpop.f32.mrf.mxu1  ;;  %v1539_v47 = vsel %vm797_vm1, %v2211_v45, 0.0 }
 0x6ba   : > { %1540 = vadd.xlane.f32.xlu1 %v1539_v47  ;;  %v1530_v48 = vsel %vm797_vm1, %v1524_v46, -inf  ;;  %v1673_v47 = vld [vmem:[#allocation13] sm:$0xff] }
 0x6bb   : > { %1531 = vmax.xlane.f32.xlu0 %v1530_v48  ;;  %v1226_v48 = vpop.f32.mrf.mxu0 }
 0x6bc   : > { %v2213_v1 = vpop.eup %2212 }
 0x6bd   : > { %v1340_v10 = vsel %vm797_vm1, %v2213_v1, 0.0 }
 0x6be   : > { %1341 = vadd.xlane.f32.xlu2 %v1340_v10 }
 0x6d3   : > { %2169 = vrot.lane.b32.xlu1 %v2978_v4, %s2564_s4 }
 0x6d6   : > { %2164 = vrot.lane.b32.xlu2 %v2993_v21, %s2563_s27  ;;  %s1780_s27 = sshll.u32 %s1777_s23, 4  ;;  %s1781_s27 = int_to_ptr.hbm [resolvable:$true] %s1780_s27 }
 0x6d7   : > { %s2480_s13 = sshra.s32 %s1781_s27, 4  ;;  %s2481_s13 = int_to_ptr.hbm [resolvable:$true] %s2480_s13 }
 0x6d8   : > { %s2482_s19 = scalar_lea.hbm %s2481_s13, 16  ;;  %p2487_p7 = scmp.lt.s32.totalorder %s2481_s13, %s3182_s10 }
 0x6d9   : > { %p2483_p1 = scmp.ne.s32.totalorder %s2481_s13, %s2482_s19  ;;  %p2488_p9 = scmp.lt.s32.totalorder %s2486_s29, %s2482_s19 }
 0x6db   : > { %p2484_p3 = pnand %p2483_p1, %p2769_p4  ;;  %p2489_p5 = por %p2488_p9, %p2487_p7 }
 0x6dd   : > { %p2485_p12 = pneg %p2484_p3 }
 0x6df   : > { %p2490_p8 = pnand %p2489_p5, %p2485_p12 }
 0x72d   : > { %v1541_v49 = vpop.xlane.xlu1 %1540 }
 0x72e   : > { %2214 = vrcp.f32 %v1541_v49  ;;  %v1532_v50 = vpop.xlane.xlu0 %1531  ;;  %v1556_v6 = vand.u32 2147483648, %v1541_v49  ;;  %vm1550_vm7 = vweird.f32 %v1541_v49  ;;  %v1554_v16 = vand.u32 2147483647, %v1541_v49 }
 0x72f   : > { %v1534_v51 = vsub.f32 %v1524_v46, %v1532_v50  ;;  %v1674_v46 = vld [vmem:[#allocation13 + $0x8] sm:$0xff]  ;;  %v1256_v50 = vadd.f32 %v3032_v17, %v1226_v48  ;;  %v1726_v17 = vld [vmem:[#allocation14 + $0x10] sm:$0xff] }
 0x730   : > { %v1557_v22 = vor.u32 1.1754944e-38, %v1556_v6  ;;  %vm1555_vm10 = vcmp.eq.f32.partialorder %v1554_v16, 8.507059e+37 }
 0x731   : > { %v1537_v52 = vmul.f32 1.442695, %v1534_v51  ;;  %v1342_v53 = vpop.xlane.xlu2 %1341 }
 0x732   : > { %2216 = vrcp.f32 %v1342_v53  ;;  %v1369_v0 = vand.u32 2147483648, %v1342_v53  ;;  %v1367_v9 = vand.u32 2147483647, %v1342_v53  ;;  %vm1363_vm3 = vweird.f32 %v1342_v53 }
 0x733   : > { %2218 = vpow2.f32 %v1537_v52 }
 0x734   : > { %v2215_v54 = vpop.eup %2214  ;;  %v1370_v13 = vor.u32 1.1754944e-38, %v1369_v0  ;;  %vm1368_vm6 = vcmp.eq.f32.partialorder %v1367_v9, 8.507059e+37  ;;  %v1724_v0 = vld [vmem:[#allocation14] sm:$0xff] }
 0x735   : > { %v1546_v62 = vmul.f32 %v2215_v54, %v1541_v49  ;;  %vm1551_vm5 = vweird.f32 %v2215_v54 }
 0x736   : > { %vm1552_vm9 = vmor %vm1550_vm7, %vm1551_vm5 }
 0x737   : > { %v1547_v58 = vsub.f32 1.0, %v1546_v62 }
 0x738   : > { %v2217_v55 = vpop.eup %2216 }
 0x739   : > { %v3050_v60 = vpop.eup %2218  ;;  %v1359_v59 = vmul.f32 %v2217_v55, %v1342_v53  ;;  %v2165_v61 = vpop.permute.xlu2 %2164  ;;  %v1548_v5 = vmul.f32 %v2215_v54, %v1547_v58  ;;  %vm1364_vm2 = vweird.f32 %v2217_v55 }
 0x73a   : > { %v2166_v4 = vunpack.i.l.bf16 %v2165_v61  ;;  %v1542_v63 = vsel %vm797_vm1, %v3050_v60, 0.0  ;;  %v2167_v3 = vunpack.i.h.bf16 %v2165_v61  ;;  %vm1365_vm4 = vmor %vm1363_vm3, %vm1364_vm2 }
 0x73b   : > { %v1360_v12 = vsub.f32 1.0, %v1359_v59  ;;  %1543 = vadd.xlane.f32.xlu0 %v1542_v63  ;;  %v1549_v14 = vadd.f32 %v2215_v54, %v1548_v5  ;;  %v2184_v5 = vld [vmem:[%s3179_s17] ss:$0 sm:$0xff] }
 0x73c   : > { %1425 = vmatpush.msrb.mxu2 %v2166_v4  ;;  %v1725_v4 = vld [vmem:[#allocation14 + $0x8] sm:$0xff] }
 0x73d   : > { %v1361_v8 = vmul.f32 %v2217_v55, %v1360_v12  ;;  %v1553_v19 = vsel %vm1552_vm9, %v2215_v54, %v1549_v14  ;;  %v2183_v54 = vld [vmem:[%s3128_s11] ss:$0 sm:$0xff] }
 0x73e   : > { %1426 = vmatpush.msrb.mxu2 %v2167_v3  ;;  %v1558_v24 = vsel %vm1555_vm10, %v1557_v22, %v1553_v19 }
 0x73f   : > { %v1362_v11 = vadd.f32 %v2217_v55, %v1361_v8  ;;  %v1559_v26 = vmul.f32 %v2211_v45, %v1558_v24  ;;  %v1675_v45 = vld [vmem:[#allocation13 + $0x10] sm:$0xff]  ;;  %v2185_v24 = vld [vmem:[%s3180_s26] ss:$0 sm:$0xff] }
 0x741   : > { %v1366_v15 = vsel %vm1365_vm4, %v2217_v55, %v1362_v11 }
 0x742   : > { %v1371_v7 = vsel %vm1368_vm6, %v1370_v13, %v1366_v15 }
 0x743   : > { %v1372_v18 = vmul.f32 %v2213_v1, %v1371_v7  ;;  %v1229_v1 = vpop.f32.mrf.mxu0 }
 0x744   : > { %v1259_v59 = vadd.f32 %v3035_v28, %v1229_v1 }
 0x745   : > { %v2170_v20 = vpop.permute.xlu1 %2169  ;;  %1997 = vmatmul.msk.f32.vlgmr.msrb.gmra.mxu2 %vm797_vm1, %v1372_v18 }
 0x746   : > { %v2171_v23 = vunpack.i.l.bf16 %v2170_v20  ;;  %v2172_v25 = vunpack.i.h.bf16 %v2170_v20 }
 0x748   : > { %1598 = vmatpush.msra.mxu2 %v2171_v23 }
 0x74a   : > { %1599 = vmatpush.msra.mxu2 %v2172_v25 }
 0x74b   : > { %v1455_v10 = vpop.f32.mrf.mxu0 }
 0x74c   : > { %1699 = vmatpush.msrb.mxu2 %v1676_v44  ;;  %v1461_v51 = vadd.f32 %v1455_v10, %v1256_v50 }
 0x74d   : > { %2006 = vmatmul.msk.f32.vlgmr.msra.gmra.mxu2 %vm797_vm1, %v1559_v26 }
 0x74e   : > { %1700 = vmatpush.msrb.mxu2 %v1675_v45 }
 0x74f   : > { %2174 = vrot.lane.b32.xlu0 %v2993_v21, %s2564_s4  ;;  %s1766_s4 = scalar_lea.sflag [#allocation4], %s2828_s14 }
 0x750   : > { %1701 = vmatpush.msrb.mxu2 %v1674_v46 }
 0x752   : > { %1702 = vmatpush.msrb.mxu2 %v1673_v47 }
 0x7ae   : > { %v1544_v27 = vpop.xlane.xlu0 %1543 }
 0x7af   : > { %2220 = vrcp.f32 %v1544_v27  ;;  %v1571_v34 = vand.u32 2147483648, %v1544_v27  ;;  %vm1565_vm12 = vweird.f32 %v1544_v27  ;;  %v1569_v35 = vand.u32 2147483647, %v1544_v27 }
 0x7b1   : > { %v1572_v37 = vor.u32 1.1754944e-38, %v1571_v34  ;;  %vm1570_vm14 = vcmp.eq.f32.partialorder %v1569_v35, 8.507059e+37 }
 0x7b5   : > { %v2221_v29 = vpop.eup %2220 }
 0x7b6   : > { %v1561_v30 = vmul.f32 %v2221_v29, %v1544_v27  ;;  %vm1566_vm11 = vweird.f32 %v2221_v29 }
 0x7b7   : > { %vm1567_vm13 = vmor %vm1565_vm12, %vm1566_vm11 }
 0x7b8   : > { %v1562_v31 = vsub.f32 1.0, %v1561_v30 }
 0x7ba   : > { %v1563_v32 = vmul.f32 %v2221_v29, %v1562_v31 }
 0x7bc   : > { %v1564_v33 = vadd.f32 %v2221_v29, %v1563_v32 }
 0x7be   : > { %v1568_v36 = vsel %vm1567_vm13, %v2221_v29, %v1564_v33 }
 0x7bf   : > { %v1573_v39 = vsel %vm1570_vm14, %v1572_v37, %v1568_v36 }
 0x7c0   : > { %v1574_v41 = vmul.f32 %v3050_v60, %v1573_v39  ;;  %v1727_v60 = vld [vmem:[#allocation14 + $0x18] sm:$0xff] }
 0x7c1   : > { %v2175_v38 = vpop.permute.xlu0 %2174  ;;  %1750 = vmatpush.msrb.mxu0 %v1727_v60 }
 0x7c2   : > { %v2176_v21 = vunpack.i.l.bf16 %v2175_v38  ;;  %v2177_v40 = vunpack.i.h.bf16 %v2175_v38 }
 0x7c3   : > { %1751 = vmatpush.msrb.mxu0 %v1726_v17 }
 0x7c4   : > { %1627 = vmatpush.msrb.mxu3 %v2176_v21 }
 0x7c5   : > { %1752 = vmatpush.msrb.mxu0 %v1725_v4 }
 0x7c6   : > { %1628 = vmatpush.msrb.mxu3 %v2177_v40 }
 0x7c7   : > { %2007 = vmatmul.msk.f32.vlgmr.msrb.gmra.mxu3 %vm797_vm1, %v1574_v41  ;;  %1753 = vmatpush.msrb.mxu0 %v1724_v0 }
 0x7c8   : > { %v1428_v42 = vpop.f32.mrf.mxu2 }
 0x7c9   : > { %1999 = vmatmul.msk.f32.gmra.mxu0 %vm874_vm8, %v1428_v42 }
 0x7d0   : > { %v1601_v43 = vpop.f32.mrf.mxu2 }
 0x7d1   : > { %2008 = vmatmul.msk.f32.vlgmr.msrb.gmra.mxu1 %vm874_vm8, %v1601_v43 }
 0x846   : > { %v1458_v58 = vpop.f32.mrf.mxu0 }
 0x847   : > { %v1462_v61 = vadd.f32 %v1458_v58, %v1259_v59 }
 0x84a   : > { %v1630_v49 = vpop.f32.mrf.mxu3 }
 0x84b   : > { %2009 = vmatmul.msk.f32.gmra.mxu1 %vm874_vm8, %v1630_v49 }
 0x84e   : > { %v1657_v52 = vpop.f32.mrf.mxu1 }
 0x84f   : > { %v1663_v53 = vadd.f32 %v1657_v52, %v1461_v51 }
 0x851   : > { %v1665_v62 = vadd.f32 %v1663_v53, %v2896_v56 }
 0x853   : > { %v1671_v55 = vadd.f32 %v2183_v54, %v1665_v62 }
 0x855   : > { %2010 = vmatmul.msk.f32.vlgmr.msrb.gmra.mxu2 %vm693_vm0, %v1671_v55 }
 0x8c8   : > { %v1660_v63 = vpop.f32.mrf.mxu1 }
 0x8c9   : > { %v1664_v12 = vadd.f32 %v1660_v63, %v1462_v61 }
 0x8cb   : > { %v1666_v3 = vadd.f32 %v1664_v12, %v2898_v57 }
 0x8cd   : > { %v1672_v56 = vadd.f32 %v2183_v54, %v1666_v3 }
 0x8cf   : > { %2011 = vmatmul.msk.f32.gmra.mxu2 %vm693_vm0, %v1672_v56 }
 0x8d8   : > { %v1704_v8 = vpop.f32.mrf.mxu2 }
 0x8d9   : > { %v1705_v28 = vadd.f32 %v2184_v5, %v1704_v8 }
 0x8db   : > { %v1712_v9 = vmul.f32 1.442695, %v1705_v28  ;;  %vm1710_vm1 = vcmp.gt.f32.partialorder %v1705_v28, 0.0 }
 0x8dd   : > { %2222 = vpow2.f32 %v1712_v9 }
 0x8e3   : > { %v2223_v11 = vpop.eup %2222 }
 0x8e4   : > { %v2012_v13 = vadd.f32 -1.0, %v2223_v11 }
 0x8e6   : > { %v1718_v14 = vmul.f32 1.6732632, %v2012_v13 }
 0x8e8   : > { %v1720_v15 = vsel %vm1710_vm1, %v1705_v28, %v1718_v14 }
 0x8e9   : > { %v1722_v6 = vmul.f32 1.050701, %v1720_v15 }
 0x8eb   : > { %2014 = vmatmul.msk.f32.vlgmr.msrb.gmra.mxu0 %vm693_vm0, %v1722_v6 }
 0x952   : > { %v1707_v57 = vpop.f32.mrf.mxu2 }
 0x953   : > { %v1708_v7 = vadd.f32 %v2184_v5, %v1707_v57 }
 0x955   : > { %v1714_v16 = vmul.f32 1.442695, %v1708_v7  ;;  %vm1711_vm8 = vcmp.gt.f32.partialorder %v1708_v7, 0.0 }
 0x957   : > { %2224 = vpow2.f32 %v1714_v16 }
 0x95d   : > { %v2225_v18 = vpop.eup %2224 }
 0x95e   : > { %v2013_v19 = vadd.f32 -1.0, %v2225_v18 }
 0x960   : > { %v1719_v20 = vmul.f32 1.6732632, %v2013_v19 }
 0x962   : > { %v1721_v22 = vsel %vm1711_vm8, %v1708_v7, %v1719_v20 }
 0x963   : > { %v1723_v23 = vmul.f32 1.050701, %v1721_v22 }
 0x965   : > { %2015 = vmatmul.msk.f32.gmra.mxu0 %vm693_vm0, %v1723_v23 }
 0x968   : > { %v1755_v25 = vpop.f32.mrf.mxu0 }
 0x969   : > { %v1756_v26 = vadd.f32 %v2185_v24, %v1755_v25 }
 0x96b   : > { %v1761_v27 = vadd.f32 %v1756_v26, %v1671_v55 }
 0x96d   : > { %1763 = vst.msk [vmem:[%s683_s0] sm:$0xff] %vm693_vm0, %v1761_v27 }
 0x9e2   : > { %v1758_v2 = vpop.f32.mrf.mxu0 }
 0x9e3   : > { %v1759_v29 = vadd.f32 %v2185_v24, %v1758_v2 }
 0x9e5   : > { %v1762_v30 = vadd.f32 %v1759_v29, %v1672_v56 }
 0x9e7   : > { %1764 = vst.msk [vmem:[%s683_s0 + $0x8] sm:$0xff] %vm693_vm0, %v1762_v30 }
 0x9e8   : > { %2493 = shalt.err (!%p2490_p8)
}
 0x9e9   : > { %s2565_s14 = smov 128   ;;  %s2566_s30 = smov 8  }
 0x9ea   : > { %2057 = dma.vmem_to_hbm [thread:$0]  (%p2769_p4), %s1779_s21, 256, %s1781_s27, %s1766_s4, %s2565_s14, %s2565_s14, %s2566_s30  }
 0x9eb PF: > { %s3183_s20 = sld [smem:[#allocation24_spill]]  ;;  %p3185_p10 = scmp.ge.s32.totalorder %s2552_s24, 2 }
 0x9ed   : > { %p2086_p13 = pnand %p3185_p10, %p2773_p6 }
 0x9ef   : > { %p2087_p11 = pneg %p2086_p13 }
 0x9f1   : > { %s1795_s0 = sand.u32 1, %s3183_s20  }
 0x9f2   : > { %s1796_s25 = scalar_lea.sflag [#allocation4], %s1795_s0 }
 0x9f3   : > { %2535 = dma.done.wait (%p2087_p11), %s1796_s25, 256  }
 0x9f4   : > { %2537 = vsyncadd (%p2087_p11), %s1796_s25, 4294967040  ;;  %s3186_s24 = sld [smem:[#allocation26_spill]]  ;;  %s3189_s21 = smov %s2544_s22 }
 0x9f5   : > { %s3187_s16 = sld [smem:[#allocation25_spill]] }
 0x9f6   : > { %s3188_s23 = sld [smem:[#allocation27_spill]] }
 0x9fa   : > { %p35_p0 = scmp.ge.s32.totalorder %s3186_s24, 4  }
 0x9fb   : > { %s3190_s22 = smov %s3187_s16 }
 0x9fc   :  { %37 = sbr.rel (!%p35_p0) target bundleno = 21 (0x15), region = 166 }
 0xa01   :  { %1802 = vsyncpa [#allocation3], 1 }
 0xa02   :  { %1804 = vsyncpa [#allocation3 + $0x1], 1 }
 0xa03   :  { %1805 = vsyncpa [#allocation6], 1 }
 0xa04   :  { %1807 = vsyncpa [#allocation6 + $0x1], 1 }
 0xa05   :  { %1808 = vsyncpa [#allocation9], 1 }
 0xa06   :  { %1809 = vsyncpa [#allocation12], 1 }
 0xa07   :  { %1810 = vsyncpa [#allocation15], 1 }
 0xa08   :  { %1811 = vsyncpa [#allocation4], 1 }
 0xa09   :  { %1813 = vsyncpa [#allocation4 + $0x1], 1 }

</bundles_post_ra>
